<compile_context>
chip_gen: v5e
topology: v5e:2x2
jax: 0.10.0
libtpu: 0.0.40
codegen_flags: <defaults>
</compile_context>

<pallas_src>
import functools

import numpy as np
import jax
import jax.numpy as jnp
from jax.experimental import pallas as pl
from jax.experimental.pallas import tpu as pltpu


# ----------------------------------------------------------------------------
# Fused kernel: 1x1 conv + ReLU + 4x4 adaptive avg-pool + loc_head -> theta
# ----------------------------------------------------------------------------
def _loc_theta_kernel(x_ref, pmat_ref, wc_ref, bc_ref, w1_ref, b1_ref,
                      w2_ref, b2_ref, theta_ref, hid_ref):
    # grid axis 0 = pooled output row i in [0, 4); hid_ref accumulates the
    # (B, 128) pre-activation of loc_head[0] across pooled rows.
    i = pl.program_id(0)
    B = theta_ref.shape[0]

    @pl.when(i == 0)
    def _init():
        hid_ref[...] = jnp.zeros_like(hid_ref)

    # 1x1 conv (+bias, ReLU) over every position of this pooled row, as one
    # matmul with a lane-dense (512-wide) output: (B*ph*W, Cin) @ (Cin, 512).
    x2d = x_ref[0]                                             # (B*ph*W, Cin)
    feat = jnp.dot(x2d, wc_ref[...], preferred_element_type=jnp.float32)
    feat = jnp.maximum(feat + bc_ref[...], 0.0)                # (B*ph*W, 512)

    # Adaptive 4x4 average pool (this pooled row) as a matmul with a constant
    # 0/(1/(ph*pw)) selection matrix: (4B, B*ph*W) @ (B*ph*W, 512) -> (4B, 512)
    # pooled row ordering: row j*B + b = pooled cell (i, j) of batch b.
    pooled = jnp.dot(pmat_ref[...], feat, preferred_element_type=jnp.float32)

    # loc_head[0] contribution of this pooled row: 4 lane-dense
    # (B,512)@(512,128) dots (one per pooled column), accumulated in VMEM.
    acc = hid_ref[...]
    for j in range(4):
        acc = acc + jnp.dot(pooled[j * B:(j + 1) * B, :], w1_ref[j],
                            preferred_element_type=jnp.float32)
    hid_ref[...] = acc

    # Last pooled row: bias + ReLU + loc_head[2] -> theta (B, 2).
    # (theta's last dim is 2 < 128 -> masked partial store; tiny, harmless.)
    @pl.when(i == pl.num_programs(0) - 1)
    def _finish():
        hid = jnp.maximum(hid_ref[...] + b1_ref[...], 0.0)
        theta_ref[...] = (jnp.dot(hid, w2_ref[...],
                                  preferred_element_type=jnp.float32)
                          + b2_ref[...])


def _pool_matrix(B, ph, W, pw):
    """(4B, B*ph*W) averaging matrix: row j*B+b selects cell column j, batch b."""
    M = B * ph * W
    m = np.arange(M)
    b = m // (ph * W)
    j = (m % W) // pw
    P = np.zeros((4 * B, M), np.float32)
    P[j * B + b, m] = 1.0 / float(ph * pw)
    return jnp.asarray(P)


def loc_theta(x_nchw, params):
    B, Cin, H, W = x_nchw.shape
    assert H % 4 == 0 and W % 4 == 0
    ph, pw = H // 4, W // 4
    C = params["wc"].shape[1]  # 512

    # Regroup x by pooled output row so each grid step DMAs one contiguous
    # slab: (B, Cin, H, W) -> (4, B*ph*W, Cin).  (One small XLA transpose of
    # the Cin=4-channel input; negligible vs. the eliminated feat round trip.)
    x_grp = (x_nchw.reshape(B, Cin, 4, ph, W)
             .transpose(2, 0, 3, 4, 1)                 # (4, B, ph, W, Cin)
             .reshape(4, B * ph * W, Cin))
    pmat = _pool_matrix(B, ph, W, pw)                  # (4B, B*ph*W)

    return pl.pallas_call(
        _loc_theta_kernel,
        out_shape=jax.ShapeDtypeStruct((B, 2), jnp.float32),
        grid=(4,),
        in_specs=[
            pl.BlockSpec((1, B * ph * W, Cin), lambda i: (i, 0, 0)),  # x slab
            pl.BlockSpec(pmat.shape, lambda i: (0, 0)),               # pool mat
            pl.BlockSpec(params["wc"].shape, lambda i: (0, 0)),       # conv w
            pl.BlockSpec(params["bc"].shape, lambda i: (0, 0)),       # conv b
            pl.BlockSpec((4, C, 128), lambda i: (i, 0, 0)),           # w1 cells of row i
            pl.BlockSpec(params["b1"].shape, lambda i: (0, 0)),
            pl.BlockSpec(params["w2"].shape, lambda i: (0, 0)),
            pl.BlockSpec(params["b2"].shape, lambda i: (0, 0)),
        ],
        out_specs=pl.BlockSpec((B, 2), lambda i: (0, 0)),
        scratch_shapes=[pltpu.VMEM((B, 128), jnp.float32)],           # hid acc
        compiler_params=pltpu.CompilerParams(
            dimension_semantics=("arbitrary",)),   # reduction over pooled rows
    )(x_grp, pmat, params["wc"], params["bc"], params["w1"], params["b1"],
      params["w2"], params["b2"])


# ----------------------------------------------------------------------------
# Gate kernel: y = x * (sigmoid(50(x-lo)) - sigmoid(50(x-hi)))
#            = x * 0.5 * (tanh(25(x-lo)) - tanh(25(x-hi)))
# ----------------------------------------------------------------------------
def _gate_kernel(x_ref, theta_ref, o_ref):
    x = x_ref[...]                                        # (B, tf)
    th_low = jnp.clip(theta_ref[:, 0:1], 0.0, 1.0)        # (B, 1)
    th_high = jnp.clip(theta_ref[:, 1:2], 0.0, 1.0)       # (B, 1)
    g = 0.5 * (jnp.tanh(25.0 * (x - th_low)) - jnp.tanh(25.0 * (x - th_high)))
    o_ref[...] = x * g


def gate_apply(x_flat, theta, max_block=8192):
    B, F = x_flat.shape
    # Largest multiple-of-128 divisor of F capped at max_block: lane-dense,
    # pipelined, megacore-parallel blocks (falls back to one block otherwise).
    tf = F
    if F % 128 == 0:
        tf = 128
        for cand in range(128, min(F, max_block) + 1, 128):
            if F % cand == 0:
                tf = cand
    return pl.pallas_call(
        _gate_kernel,
        out_shape=jax.ShapeDtypeStruct((B, F), jnp.float32),
        grid=(F // tf,),
        in_specs=[
            pl.BlockSpec((B, tf), lambda j: (0, j)),
            pl.BlockSpec((B, 2), lambda j: (0, 0)),
        ],
        out_specs=pl.BlockSpec((B, tf), lambda j: (0, j)),
        compiler_params=pltpu.CompilerParams(
            dimension_semantics=("parallel",)),
    )(x_flat, theta)


# ----------------------------------------------------------------------------
# ITN forward (glue in plain JAX, compute in Pallas)
# ----------------------------------------------------------------------------
def init_params(key, in_channels):
    k1, k2, k3 = jax.random.split(key, 3)
    # loc_net stand-in: 1x1 conv (Cin -> 512) + ReLU.
    wc = jax.random.normal(k1, (in_channels, 512), jnp.float32) * 0.1
    bc = jnp.zeros((1, 512), jnp.float32)
    # loc_head[0]: Linear(512*4*4 -> 128), stored per pooled cell:
    # w1[i*4 + j, c, :] is the weight column for pooled cell (row i, col j),
    # channel c.  To load real PyTorch weights Wt with shape (128, 8192)
    # (flatten index c*16 + i*4 + j): w1[i*4+j, c, :] = Wt[:, c*16 + i*4 + j].
    w1 = jax.random.normal(k2, (16, 512, 128), jnp.float32) * 0.01
    b1 = jax.random.normal(k3, (1, 128), jnp.float32) * 0.01
    # loc_head[2]: weight zeroed, bias = [0, 1] (as in the PyTorch module).
    w2 = jnp.zeros((128, 2), jnp.float32)
    b2 = jnp.array([[0.0, 1.0]], jnp.float32)
    return dict(wc=wc, bc=bc, w1=w1, b1=b1, w2=w2, b2=b2)


@functools.partial(jax.jit, static_argnames=("output_theta",))
def itn_forward(x_nchw, params, output_theta=False):
    B, C, H, W = x_nchw.shape
    # TODO(synk): x.detach().clone() in stn() is dead at inference time; omitted.
    theta = loc_theta(x_nchw, params)                       # (B, 2)
    y_flat = gate_apply(x_nchw.reshape(B, C * H * W), theta)
    y = y_flat.reshape(B, C, H, W)
    if output_theta:
        return y, theta
    return y


if __name__ == "__main__":
    key = jax.random.PRNGKey(0)
    kx, kp = jax.random.split(key)
    x = jax.random.normal(kx, (2, 4, 16, 16), jnp.float32)   # NCHW like PyTorch
    params = init_params(kp, in_channels=4)

    y, theta = itn_forward(x, params, output_theta=True)
    jax.block_until_ready((y, theta))

    assert y.shape == x.shape and y.dtype == jnp.float32
    assert theta.shape == (2, 2)
    print("KERNEL_OK")
</pallas_src>

<mosaic_0001>
module attributes {stable_mosaic.version = 11 : i64} {
  func.func @_loc_theta_kernel(%arg0: i32, %arg1: memref<1x128x4xf32, #tpu.memory_space<vmem>>, %arg2: memref<8x128xf32, #tpu.memory_space<vmem>>, %arg3: memref<4x512xf32, #tpu.memory_space<vmem>>, %arg4: memref<1x512xf32, #tpu.memory_space<vmem>>, %arg5: memref<4x512x128xf32, #tpu.memory_space<vmem>>, %arg6: memref<1x128xf32, #tpu.memory_space<vmem>>, %arg7: memref<128x2xf32, #tpu.memory_space<vmem>>, %arg8: memref<1x2xf32, #tpu.memory_space<vmem>>, %arg9: memref<2x2xf32, #tpu.memory_space<vmem>>, %arg10: memref<2x128xf32, #tpu.memory_space<vmem>>) attributes {dimension_semantics = [#tpu.dimension_semantics<arbitrary>], iteration_bounds = array<i64: 4>, scalar_prefetch = 0 : i64, scratch_operands = 1 : i64, tpu.core_type = #tpu.core_type<tc>, window_params = [{transform_indices = @transform_0, window_bounds = array<i64: 1, 128, 4>}, {pipeline_mode = #tpu.pipeline_mode<synchronous>, transform_indices = @transform_1, window_bounds = array<i64: 8, 128>}, {pipeline_mode = #tpu.pipeline_mode<synchronous>, transform_indices = @transform_2, window_bounds = array<i64: 4, 512>}, {pipeline_mode = #tpu.pipeline_mode<synchronous>, transform_indices = @transform_3, window_bounds = array<i64: 1, 512>}, {transform_indices = @transform_4, window_bounds = array<i64: 4, 512, 128>}, {pipeline_mode = #tpu.pipeline_mode<synchronous>, transform_indices = @transform_5, window_bounds = array<i64: 1, 128>}, {pipeline_mode = #tpu.pipeline_mode<synchronous>, transform_indices = @transform_6, window_bounds = array<i64: 128, 2>}, {pipeline_mode = #tpu.pipeline_mode<synchronous>, transform_indices = @transform_7, window_bounds = array<i64: 1, 2>}, {pipeline_mode = #tpu.pipeline_mode<synchronous>, transform_indices = @transform_8, window_bounds = array<i64: 2, 2>}]} {
    %c0_i32 = arith.constant 0 : i32
    %0 = arith.cmpi eq, %arg0, %c0_i32 : i32
    %1 = arith.extui %0 : i1 to i32
    %c0_i32_0 = arith.constant 0 : i32
    %2 = arith.cmpi ne, %1, %c0_i32_0 : i32
    scf.if %2 {
      %cst_29 = arith.constant 0.000000e+00 : f32
      %39 = vector.broadcast %cst_29 : f32 to vector<2x128xf32>
      %c0_30 = arith.constant 0 : index
      %c0_31 = arith.constant 0 : index
      %40 = vector.load %arg10[%c0_30, %c0_31] : memref<2x128xf32, #tpu.memory_space<vmem>>, vector<2x128xf32>
      tpu.vector_store %arg10[%c0_30, %c0_31], %39 {strides = array<i32>} : memref<2x128xf32, #tpu.memory_space<vmem>>, vector<2x128xf32>,
    } else {
    }
    %c0 = arith.constant 0 : index
    %c0_1 = arith.constant 0 : index
    %c0_2 = arith.constant 0 : index
    %3 = vector.load %arg1[%c0, %c0_1, %c0_2] : memref<1x128x4xf32, #tpu.memory_space<vmem>>, vector<1x128x4xf32>
    %4 = vector.shape_cast %3 : vector<1x128x4xf32> to vector<128x4xf32>
    %c0_3 = arith.constant 0 : index
    %c0_4 = arith.constant 0 : index
    %5 = vector.load %arg3[%c0_3, %c0_4] : memref<4x512xf32, #tpu.memory_space<vmem>>, vector<4x512xf32>
    %cst = arith.constant dense<0.000000e+00> : vector<128x512xf32>
    %6 = tpu.matmul %4, %5, %cst {dimension_numbers = #tpu.dot_dimension_numbers<[1], [0], [0], [1], [0, 0, 1, 1], [], []>} : vector<128x4xf32>, vector<4x512xf32>, vector<128x512xf32> -> vector<128x512xf32>
    %c0_5 = arith.constant 0 : index
    %c0_6 = arith.constant 0 : index
    %7 = vector.load %arg4[%c0_5, %c0_6] : memref<1x512xf32, #tpu.memory_space<vmem>>, vector<1x512xf32>
    %8 = vector.broadcast %7 : vector<1x512xf32> to vector<128x512xf32>
    %9 = arith.addf %6, %8 : vector<128x512xf32>
    %cst_7 = arith.constant 0.000000e+00 : f32
    %10 = vector.broadcast %cst_7 : f32 to vector<128x512xf32>
    %11 = arith.maximumf %9, %10 : vector<128x512xf32>
    %c0_8 = arith.constant 0 : index
    %c0_9 = arith.constant 0 : index
    %12 = vector.load %arg2[%c0_8, %c0_9] : memref<8x128xf32, #tpu.memory_space<vmem>>, vector<8x128xf32>
    %cst_10 = arith.constant dense<0.000000e+00> : vector<8x512xf32>
    %13 = tpu.matmul %12, %11, %cst_10 {dimension_numbers = #tpu.dot_dimension_numbers<[1], [0], [0], [1], [0, 0, 1, 1], [], []>} : vector<8x128xf32>, vector<128x512xf32>, vector<8x512xf32> -> vector<8x512xf32>
    %c0_11 = arith.constant 0 : index
    %c0_12 = arith.constant 0 : index
    %14 = vector.load %arg10[%c0_11, %c0_12] : memref<2x128xf32, #tpu.memory_space<vmem>>, vector<2x128xf32>
    %15 = vector.extract_strided_slice %13 {offsets = [0, 0], sizes = [2, 512], strides = [1, 1]} : vector<8x512xf32> to vector<2x512xf32>
    %c0_13 = arith.constant 0 : index
    %c0_14 = arith.constant 0 : index
    %c0_15 = arith.constant 0 : index
    %16 = vector.load %arg5[%c0_13, %c0_14, %c0_15] : memref<4x512x128xf32, #tpu.memory_space<vmem>>, vector<1x512x128xf32>
    %17 = vector.shape_cast %16 : vector<1x512x128xf32> to vector<512x128xf32>
    %cst_16 = arith.constant dense<0.000000e+00> : vector<2x128xf32>
    %18 = tpu.matmul %15, %17, %cst_16 {dimension_numbers = #tpu.dot_dimension_numbers<[1], [0], [0], [1], [0, 0, 1, 1], [], []>} : vector<2x512xf32>, vector<512x128xf32>, vector<2x128xf32> -> vector<2x128xf32>
    %19 = arith.addf %14, %18 : vector<2x128xf32>
    %20 = vector.extract_strided_slice %13 {offsets = [2, 0], sizes = [2, 512], strides = [1, 1]} : vector<8x512xf32> to vector<2x512xf32>
    %c1 = arith.constant 1 : index
    %c0_17 = arith.constant 0 : index
    %c0_18 = arith.constant 0 : index
    %21 = vector.load %arg5[%c1, %c0_17, %c0_18] : memref<4x512x128xf32, #tpu.memory_space<vmem>>, vector<1x512x128xf32>
    %22 = vector.shape_cast %21 : vector<1x512x128xf32> to vector<512x128xf32>
    %cst_19 = arith.constant dense<0.000000e+00> : vector<2x128xf32>
    %23 = tpu.matmul %20, %22, %cst_19 {dimension_numbers = #tpu.dot_dimension_numbers<[1], [0], [0], [1], [0, 0, 1, 1], [], []>} : vector<2x512xf32>, vector<512x128xf32>, vector<2x128xf32> -> vector<2x128xf32>
    %24 = arith.addf %19, %23 : vector<2x128xf32>
    %25 = vector.extract_strided_slice %13 {offsets = [4, 0], sizes = [2, 512], strides = [1, 1]} : vector<8x512xf32> to vector<2x512xf32>
    %c2 = arith.constant 2 : index
    %c0_20 = arith.constant 0 : index
    %c0_21 = arith.constant 0 : index
    %26 = vector.load %arg5[%c2, %c0_20, %c0_21] : memref<4x512x128xf32, #tpu.memory_space<vmem>>, vector<1x512x128xf32>
    %27 = vector.shape_cast %26 : vector<1x512x128xf32> to vector<512x128xf32>
    %cst_22 = arith.constant dense<0.000000e+00> : vector<2x128xf32>
    %28 = tpu.matmul %25, %27, %cst_22 {dimension_numbers = #tpu.dot_dimension_numbers<[1], [0], [0], [1], [0, 0, 1, 1], [], []>} : vector<2x512xf32>, vector<512x128xf32>, vector<2x128xf32> -> vector<2x128xf32>
    %29 = arith.addf %24, %28 : vector<2x128xf32>
    %30 = vector.extract_strided_slice %13 {offsets = [6, 0], sizes = [2, 512], strides = [1, 1]} : vector<8x512xf32> to vector<2x512xf32>
    %c3 = arith.constant 3 : index
    %c0_23 = arith.constant 0 : index
    %c0_24 = arith.constant 0 : index
    %31 = vector.load %arg5[%c3, %c0_23, %c0_24] : memref<4x512x128xf32, #tpu.memory_space<vmem>>, vector<1x512x128xf32>
    %32 = vector.shape_cast %31 : vector<1x512x128xf32> to vector<512x128xf32>
    %cst_25 = arith.constant dense<0.000000e+00> : vector<2x128xf32>
    %33 = tpu.matmul %30, %32, %cst_25 {dimension_numbers = #tpu.dot_dimension_numbers<[1], [0], [0], [1], [0, 0, 1, 1], [], []>} : vector<2x512xf32>, vector<512x128xf32>, vector<2x128xf32> -> vector<2x128xf32>
    %34 = arith.addf %29, %33 : vector<2x128xf32>
    %c0_26 = arith.constant 0 : index
    %c0_27 = arith.constant 0 : index
    %35 = vector.load %arg10[%c0_26, %c0_27] : memref<2x128xf32, #tpu.memory_space<vmem>>, vector<2x128xf32>
    tpu.vector_store %arg10[%c0_26, %c0_27], %34 {strides = array<i32>} : memref<2x128xf32, #tpu.memory_space<vmem>>, vector<2x128xf32>,
    %c3_i32 = arith.constant 3 : i32
    %36 = arith.cmpi eq, %arg0, %c3_i32 : i32
    %37 = arith.extui %36 : i1 to i32
    %c0_i32_28 = arith.constant 0 : i32
    %38 = arith.cmpi ne, %37, %c0_i32_28 : i32
    scf.if %38 {
      %c0_29 = arith.constant 0 : index
      %c0_30 = arith.constant 0 : index
      %39 = vector.load %arg10[%c0_29, %c0_30] : memref<2x128xf32, #tpu.memory_space<vmem>>, vector<2x128xf32>
      %c0_31 = arith.constant 0 : index
      %c0_32 = arith.constant 0 : index
      %40 = vector.load %arg6[%c0_31, %c0_32] : memref<1x128xf32, #tpu.memory_space<vmem>>, vector<1x128xf32>
      %41 = vector.broadcast %40 : vector<1x128xf32> to vector<2x128xf32>
      %42 = arith.addf %39, %41 : vector<2x128xf32>
      %cst_33 = arith.constant 0.000000e+00 : f32
      %43 = vector.broadcast %cst_33 : f32 to vector<2x128xf32>
      %44 = arith.maximumf %42, %43 : vector<2x128xf32>
      %c0_34 = arith.constant 0 : index
      %c0_35 = arith.constant 0 : index
      %45 = vector.load %arg7[%c0_34, %c0_35] : memref<128x2xf32, #tpu.memory_space<vmem>>, vector<128x2xf32>
      %cst_36 = arith.constant dense<0.000000e+00> : vector<2x2xf32>
      %46 = tpu.matmul %44, %45, %cst_36 {dimension_numbers = #tpu.dot_dimension_numbers<[1], [0], [0], [1], [0, 0, 1, 1], [], []>} : vector<2x128xf32>, vector<128x2xf32>, vector<2x2xf32> -> vector<2x2xf32>
      %c0_37 = arith.constant 0 : index
      %c0_38 = arith.constant 0 : index
      %47 = vector.load %arg8[%c0_37, %c0_38] : memref<1x2xf32, #tpu.memory_space<vmem>>, vector<1x2xf32>
      %48 = vector.broadcast %47 : vector<1x2xf32> to vector<2x2xf32>
      %49 = arith.addf %46, %48 : vector<2x2xf32>
      %c0_39 = arith.constant 0 : index
      %c0_40 = arith.constant 0 : index
      %50 = vector.load %arg9[%c0_39, %c0_40] : memref<2x2xf32, #tpu.memory_space<vmem>>, vector<2x2xf32>
      tpu.vector_store %arg9[%c0_39, %c0_40], %49 {strides = array<i32>} : memref<2x2xf32, #tpu.memory_space<vmem>>, vector<2x2xf32>,
    } else {
    }
    return
  }
  func.func @transform_0(%arg0: i32) -> (i32, i32, i32) {
    %c0_i32 = arith.constant 0 : i32
    %c0_i32_0 = arith.constant 0 : i32
    %c0_i32_1 = arith.constant 0 : i32
    return %arg0, %c0_i32, %c0_i32_0 : i32, i32, i32
  }
  func.func @transform_1(%arg0: i32) -> (i32, i32) {
    %c0_i32 = arith.constant 0 : i32
    %c0_i32_0 = arith.constant 0 : i32
    %c0_i32_1 = arith.constant 0 : i32
    return %c0_i32, %c0_i32_0 : i32, i32
  }
  func.func @transform_2(%arg0: i32) -> (i32, i32) {
    %c0_i32 = arith.constant 0 : i32
    %c0_i32_0 = arith.constant 0 : i32
    %c0_i32_1 = arith.constant 0 : i32
    return %c0_i32, %c0_i32_0 : i32, i32
  }
  func.func @transform_3(%arg0: i32) -> (i32, i32) {
    %c0_i32 = arith.constant 0 : i32
    %c0_i32_0 = arith.constant 0 : i32
    %c0_i32_1 = arith.constant 0 : i32
    return %c0_i32, %c0_i32_0 : i32, i32
  }
  func.func @transform_4(%arg0: i32) -> (i32, i32, i32) {
    %c0_i32 = arith.constant 0 : i32
    %c0_i32_0 = arith.constant 0 : i32
    %c0_i32_1 = arith.constant 0 : i32
    return %arg0, %c0_i32, %c0_i32_0 : i32, i32, i32
  }
  func.func @transform_5(%arg0: i32) -> (i32, i32) {
    %c0_i32 = arith.constant 0 : i32
    %c0_i32_0 = arith.constant 0 : i32
    %c0_i32_1 = arith.constant 0 : i32
    return %c0_i32, %c0_i32_0 : i32, i32
  }
  func.func @transform_6(%arg0: i32) -> (i32, i32) {
    %c0_i32 = arith.constant 0 : i32
    %c0_i32_0 = arith.constant 0 : i32
    %c0_i32_1 = arith.constant 0 : i32
    return %c0_i32, %c0_i32_0 : i32, i32
  }
  func.func @transform_7(%arg0: i32) -> (i32, i32) {
    %c0_i32 = arith.constant 0 : i32
    %c0_i32_0 = arith.constant 0 : i32
    %c0_i32_1 = arith.constant 0 : i32
    return %c0_i32, %c0_i32_0 : i32, i32
  }
  func.func @transform_8(%arg0: i32) -> (i32, i32) {
    %c0_i32 = arith.constant 0 : i32
    %c0_i32_0 = arith.constant 0 : i32
    %c0_i32_1 = arith.constant 0 : i32
    return %c0_i32, %c0_i32_0 : i32, i32
  }
}

module attributes {stable_mosaic.version = 11 : i64} {
  func.func @_gate_kernel(%arg0: i32, %arg1: memref<2x1024xf32, #tpu.memory_space<vmem>>, %arg2: memref<2x2xf32, #tpu.memory_space<vmem>>, %arg3: memref<2x1024xf32, #tpu.memory_space<vmem>>) attributes {dimension_semantics = [#tpu.dimension_semantics<parallel>], iteration_bounds = array<i64: 1>, scalar_prefetch = 0 : i64, scratch_operands = 0 : i64, tpu.core_type = #tpu.core_type<tc>, window_params = [{transform_indices = @transform_0, window_bounds = array<i64: 2, 1024>}, {pipeline_mode = #tpu.pipeline_mode<synchronous>, transform_indices = @transform_1, window_bounds = array<i64: 2, 2>}, {transform_indices = @transform_2, window_bounds = array<i64: 2, 1024>}]} {
    %c0 = arith.constant 0 : index
    %c0_0 = arith.constant 0 : index
    %0 = vector.load %arg1[%c0, %c0_0] : memref<2x1024xf32, #tpu.memory_space<vmem>>, vector<2x1024xf32>
    %c0_1 = arith.constant 0 : index
    %c0_2 = arith.constant 0 : index
    %1 = vector.load %arg2[%c0_1, %c0_2] : memref<2x2xf32, #tpu.memory_space<vmem>>, vector<2x1xf32>
    %cst = arith.constant 0.000000e+00 : f32
    %cst_3 = arith.constant 1.000000e+00 : f32
    %2 = vector.broadcast %cst : f32 to vector<2x1xf32>
    %3 = arith.maximumf %2, %1 : vector<2x1xf32>
    %4 = vector.broadcast %cst_3 : f32 to vector<2x1xf32>
    %5 = arith.minimumf %4, %3 : vector<2x1xf32>
    %c0_4 = arith.constant 0 : index
    %c1 = arith.constant 1 : index
    %6 = vector.load %arg2[%c0_4, %c1] : memref<2x2xf32, #tpu.memory_space<vmem>>, vector<2x1xf32>
    %cst_5 = arith.constant 0.000000e+00 : f32
    %cst_6 = arith.constant 1.000000e+00 : f32
    %7 = vector.broadcast %cst_5 : f32 to vector<2x1xf32>
    %8 = arith.maximumf %7, %6 : vector<2x1xf32>
    %9 = vector.broadcast %cst_6 : f32 to vector<2x1xf32>
    %10 = arith.minimumf %9, %8 : vector<2x1xf32>
    %11 = vector.broadcast %5 : vector<2x1xf32> to vector<2x1024xf32>
    %12 = arith.subf %0, %11 : vector<2x1024xf32>
    %cst_7 = arith.constant 2.500000e+01 : f32
    %13 = vector.broadcast %cst_7 : f32 to vector<2x1024xf32>
    %14 = arith.mulf %13, %12 : vector<2x1024xf32>
    %15 = math.tanh %14 : vector<2x1024xf32>
    %16 = vector.broadcast %10 : vector<2x1xf32> to vector<2x1024xf32>
    %17 = arith.subf %0, %16 : vector<2x1024xf32>
    %cst_8 = arith.constant 2.500000e+01 : f32
    %18 = vector.broadcast %cst_8 : f32 to vector<2x1024xf32>
    %19 = arith.mulf %18, %17 : vector<2x1024xf32>
    %20 = math.tanh %19 : vector<2x1024xf32>
    %21 = arith.subf %15, %20 : vector<2x1024xf32>
    %cst_9 = arith.constant 5.000000e-01 : f32
    %22 = vector.broadcast %cst_9 : f32 to vector<2x1024xf32>
    %23 = arith.mulf %22, %21 : vector<2x1024xf32>
    %24 = arith.mulf %0, %23 : vector<2x1024xf32>
    %c0_10 = arith.constant 0 : index
    %c0_11 = arith.constant 0 : index
    %25 = vector.load %arg3[%c0_10, %c0_11] : memref<2x1024xf32, #tpu.memory_space<vmem>>, vector<2x1024xf32>
    tpu.vector_store %arg3[%c0_10, %c0_11], %24 {strides = array<i32>} : memref<2x1024xf32, #tpu.memory_space<vmem>>, vector<2x1024xf32>,
    return
  }
  func.func @transform_0(%arg0: i32) -> (i32, i32) {
    %c0_i32 = arith.constant 0 : i32
    %c0_i32_0 = arith.constant 0 : i32
    return %c0_i32, %arg0 : i32, i32
  }
  func.func @transform_1(%arg0: i32) -> (i32, i32) {
    %c0_i32 = arith.constant 0 : i32
    %c0_i32_0 = arith.constant 0 : i32
    %c0_i32_1 = arith.constant 0 : i32
    return %c0_i32, %c0_i32_0 : i32, i32
  }
  func.func @transform_2(%arg0: i32) -> (i32, i32) {
    %c0_i32 = arith.constant 0 : i32
    %c0_i32_0 = arith.constant 0 : i32
    return %c0_i32, %arg0 : i32, i32
  }
}

</mosaic_0001>

<bundles_post_ra>
// kernel: itn_forward.3
= control target key start
LH: loop header
LB: loop body
LE: loop exit
PB: predicated region body
PF: predicated region fallthrough
CT: control target
= control target key end

     0   :  { %v70_v0 = vmov 0   ;;  %v71_v4 = vmov 1   ;;  %v72_v5 = vmov 269488144   ;;  %s103_s1 = inlined_call_operand.vmem [shape: f32[2,2], index: 1, kind: input, shape index: {}]   ;;  %s104_s0 = inlined_call_operand.vmem [shape: f32[2,1024], index: 0, kind: input, shape index: {}]   ;;  %s105_s2 = inlined_call_operand.vmem [shape: f32[2,1024], index: 2, kind: output, shape index: {}]  }
   0x1   :  { %60 = vset.pattern.permute.xlu0 %v70_v0  ;;  %v13_v1 = vld [vmem:[%s103_s1] sm:$0x3]  ;;  %v21_v6 = vunpack.c.l.s4 %v72_v5  ;;  %v12_v11 = vld [vmem:[%s104_s0 + $0x8] sm:$0xff] }
   0x2   :  { %v14_v2 = vmax.f32 %v13_v1, 0.0  ;;  %v11_v10 = vld [vmem:[%s104_s0] sm:$0xff] }
   0x3   :  { %v22_v7 = vunpack.c.0.s8 %v21_v6 }
   0x4   :  { %v15_v3 = vmin.f32 %v14_v2, 1.0 }
   0x6   :  { %18 = vperm.xlu0 %60, %v15_v3  }
   0xe   :  { %61 = vset.pattern.permute.xlu0 %v71_v4 }
   0xf   :  { %32 = vperm.xlu0 %61, %v15_v3  }
  0x78   :  { %v19_v8 = vpop.permute.xlu0 %18 }
  0x79   :  { %v23_v9 = vperm.slane %v19_v8, %v22_v7 }
  0x7b   :  { %v25_v12 = vsub.f32 %v11_v10, %v23_v9  ;;  %v26_v13 = vsub.f32 %v12_v11, %v23_v9 }
  0x7d   :  { %v27_v15 = vmul.f32 25.0, %v25_v12  ;;  %v28_v17 = vmul.f32 25.0, %v26_v13 }
  0x7f   :  { %62 = vtanh.f32 %v27_v15 }
  0x80   :  { %64 = vtanh.f32 %v28_v17 }
  0x81   :  { %v33_v14 = vpop.permute.xlu0 %32 }
  0x82   :  { %v37_v16 = vperm.slane %v33_v14, %v22_v7 }
  0x84   :  { %v39_v18 = vsub.f32 %v11_v10, %v37_v16  ;;  %v40_v19 = vsub.f32 %v12_v11, %v37_v16 }
  0x85   :  { %v63_v22 = vpop.eup %62 }
  0x86   :  { %v41_v20 = vmul.f32 25.0, %v39_v18  ;;  %v42_v21 = vmul.f32 25.0, %v40_v19  ;;  %v65_v23 = vpop.eup %64 }
  0x88   :  { %66 = vtanh.f32 %v41_v20 }
  0x89   :  { %68 = vtanh.f32 %v42_v21 }
  0x8e   :  { %v67_v24 = vpop.eup %66 }
  0x8f   :  { %v69_v25 = vpop.eup %68  ;;  %v45_v26 = vsub.f32 %v63_v22, %v67_v24 }
  0x90   :  { %v46_v27 = vsub.f32 %v65_v23, %v69_v25 }
  0x91   :  { %v47_v28 = vmul.f32 0.5, %v45_v26 }
  0x92   :  { %v48_v29 = vmul.f32 0.5, %v46_v27 }
  0x93   :  { %v49_v30 = vmul.f32 %v47_v28, %v11_v10 }
  0x94   :  { %v50_v31 = vmul.f32 %v48_v29, %v12_v11 }
  0x95   :  { %51 = vst [vmem:[%s105_s2] sm:$0xff] %v49_v30 }
  0x96   :  { %52 = vst [vmem:[%s105_s2 + $0x8] sm:$0xff] %v50_v31 }

// kernel: itn_forward.2
= control target key start
LH: loop header
LB: loop body
LE: loop exit
PB: predicated region body
PF: predicated region fallthrough
CT: control target
= control target key end

     0   :  { %13 = vsyncpa [#allocation4], 0  ;;  %s3116_s0 = inlined_call_operand.vmem [shape: f32[4,128,4], index: 0, kind: input, shape index: {}]   ;;  %s3117_s1 = inlined_call_operand.hbm [shape: f32[8,128], index: 1, kind: input, shape index: {}]   ;;  %s3118_s2 = inlined_call_operand.hbm [shape: f32[4,512], index: 2, kind: input, shape index: {}]   ;;  %s3119_s3 = inlined_call_operand.hbm [shape: f32[1,512], index: 3, kind: input, shape index: {}]   ;;  %s3120_s4 = inlined_call_operand.hbm [shape: f32[16,512,128], index: 4, kind: input, shape index: {}]   ;;  %s3121_s5 = inlined_call_operand.hbm [shape: f32[1,128], index: 5, kind: input, shape index: {}]   ;;  %s3122_s6 = inlined_call_operand.vmem [shape: f32[128,2], index: 6, kind: input, shape index: {}]   ;;  %s3123_s7 = inlined_call_operand.hbm [shape: f32[1,2], index: 7, kind: input, shape index: {}]   ;;  %s3124_s8 = inlined_call_operand.vmem [shape: f32[2,2], index: 8, kind: output, shape index: {}]  }
   0x1   :  { %14 = vsyncpa [#allocation6], 0 }
   0x2   :  { %15 = vsyncpa [#allocation9], 0 }
   0x3   :  { %17 = vsyncpa [#allocation9 + $0x1], 0 }
   0x4   :  { %18 = vsyncpa [#allocation12], 0  ;;  %s2348_s27 = smov 0   ;;  %s2350_s28 = smov 0  }
   0x5   :  { %s2352_s29 = smov 0   ;;  %s2354_s30 = smov 0  }
   0x6 LB: > { %s2367_s9 = sadd.s32 4294967295, %s2293_s30   ;;  %p133_p0 = scmp.ne.s32.totalorder %s2285_s28, %s2281_s27  ;;  %s2293_s30 = sphi %s2354_s30, %s3158_s30   ;;  %s2289_s29 = sphi %s2352_s29, %s3157_s29   ;;  %s2285_s28 = sphi %s2350_s28, %s3156_s28   ;;  %s2281_s27 = sphi %s2348_s27, %s3155_s27  }
   0x7   : > { %p134_p1 = scmp.eq.s32.totalorder %s2367_s9, 0  ;;  %p1681_p2 = scmp.ge.s32.totalorder %s2293_s30, 1 }
   0x8   : > { %p228_p3 = scmp.lt.s32.totalorder %s2293_s30, 5  ;;  %p1682_p4 = scmp.ne.s32.totalorder %s2367_s9, 0 }
   0x9   : > { %p2376_p5 = por %p134_p1, %p133_p0  ;;  %s252_s13 = sshll.u32 %s3118_s2, 4  ;;  %s253_s13 = int_to_ptr.hbm [resolvable:$true] %s252_s13 }
   0xa   : > { %p2383_p6 = pnand %p1681_p2, %p228_p3  ;;  %s2295_s15 = smov [#allocation5]  }
   0xb   : > { %s254_s16 = sshll.u32 %s2295_s15, 4  ;;  %s276_s19 = sshll.u32 %s3121_s5, 4  ;;  %s255_s16 = int_to_ptr.vmem [resolvable:$true] %s254_s16  ;;  %s277_s19 = int_to_ptr.hbm [resolvable:$true] %s276_s19 }
   0xc   : > { %p1990_p7 = pneg %p2383_p6  ;;  %s240_s23 = sshll.u32 %s3117_s1, 4  ;;  %s241_s23 = int_to_ptr.hbm [resolvable:$true] %s240_s23 }
   0xd   : > { %s2296_s24 = smov [#allocation10]   ;;  %s264_s11 = sshll.u32 %s3119_s3, 4  ;;  %s265_s11 = int_to_ptr.hbm [resolvable:$true] %s264_s11 }
   0xe   : > { %p2394_p8 = pnand %p1990_p7, %p134_p1  ;;  %s278_s25 = sshll.u32 %s2296_s24, 4  ;;  %s279_s25 = int_to_ptr.vmem [resolvable:$true] %s278_s25 }
   0xf   : > { %s2297_s12 = smov [#allocation3]   ;;  %s2299_s21 = smov [#allocation11]  }
  0x10   : > { %1996 = dma.hbm_to_vmem [thread:$0]  (!%p2394_p8), %s253_s13, 256, %s255_s16, [#allocation6]  }
  0x11   : > { %2002 = dma.hbm_to_vmem [thread:$0]  (!%p2394_p8), %s277_s19, 16, %s279_s25, [#allocation9]  }
  0x12   : > { %s242_s15 = sshll.u32 %s2297_s12, 4  ;;  %s2298_s13 = smov [#allocation7]   ;;  %s243_s15 = int_to_ptr.vmem [resolvable:$true] %s242_s15 }
  0x13   : > { %1993 = dma.hbm_to_vmem [thread:$0]  (!%p2394_p8), %s241_s23, 128, %s243_s15, [#allocation4]  }
  0x14   : > { %s266_s16 = sshll.u32 %s2298_s13, 4  ;;  %s291_s19 = sshll.u32 %s3123_s7, 4  ;;  %s267_s16 = int_to_ptr.vmem [resolvable:$true] %s266_s16  ;;  %s292_s19 = int_to_ptr.hbm [resolvable:$true] %s291_s19 }
  0x15   : > { %1999 = dma.hbm_to_vmem [thread:$0]  (!%p2394_p8), %s265_s11, 64, %s267_s16, [#allocation6]  }
  0x16   : > { %s293_s22 = sshll.u32 %s2299_s21, 4  ;;  %s2416_s23 = sadd.s32 1, %s2293_s30   ;;  %s294_s22 = int_to_ptr.vmem [resolvable:$true] %s293_s22 }
  0x17   : > { %2005 = dma.hbm_to_vmem [thread:$0]  (!%p2394_p8), %s292_s19, 16, %s294_s22, [#allocation12]  }
  0x18   : > { %s117_s24 = ssub.s32 %s2293_s30, %s2416_s23  ;;  %s120_s25 = sadd.s32 1, %s2289_s29 }
  0x19   : > { %p118_p9 = scmp.eq.s32.totalorder %s117_s24, 0  ;;  %p127_p10 = scmp.ne.s32.totalorder %s2289_s29, %s2285_s28 }
  0x1a   : > { %p128_p11 = scmp.eq.s32.totalorder %s2293_s30, 0  ;;  %p2015_p12 = scmp.lt.s32.totalorder %s2293_s30, 4 }
  0x1b   : > { %s2428_s26 = scalar_select %p118_p9, %s2289_s29, %s120_s25  }
  0x1c   : > { %p129_p13 = por %p128_p11, %p127_p10  ;;  %s312_s27 = sand.u32 1, %s2293_s30  }
  0x1d   : > { %s314_s11 = sand.u32 1, %s2289_s29   ;;  %s1966_s15 = sshll.u32 %s2293_s30, 11 }
  0x1e   : > { %s1688_s12 = sshll.u32 %s314_s11, 11  ;;  %s322_s20 = scalar_lea.hbm %s3120_s4, %s1966_s15 }
  0x1f   : > { %s323_s17 = sshll.u32 %s322_s20, 4  ;;  %s316_s18 = scalar_lea.vmem [#allocation8], %s1688_s12  ;;  %s324_s17 = int_to_ptr.hbm [resolvable:$true] %s323_s17 }
  0x20   : > { %s325_s19 = sshll.u32 %s316_s18, 4  ;;  %p2438_p0 = pnand %p2015_p12, %p129_p13  ;;  %s326_s19 = int_to_ptr.vmem [resolvable:$true] %s325_s19 }
  0x21   : > { %s313_s22 = scalar_lea.sflag [#allocation9], %s312_s27  ;;  %s2213_s24 = sshra.s32 %s324_s17, 4  ;;  %s2214_s24 = int_to_ptr.hbm [resolvable:$true] %s2213_s24 }
  0x22   : > { %s2215_s25 = scalar_lea.hbm %s2214_s24, 2048  ;;  %p2217_p3 = pneg %p2438_p0 }
  0x23   : > { %p2216_p2 = scmp.ne.s32.totalorder %s2214_s24, %s2215_s25  ;;  %s2220_s15 = scalar_lea.hbm %s3120_s4, 8192 }
  0x24   : > { %p2221_p9 = scmp.lt.s32.totalorder %s2214_s24, %s3120_s4  ;;  %p2222_p10 = scmp.lt.s32.totalorder %s2220_s15, %s2215_s25 }
  0x25   : > { %p2218_p7 = pnand %p2217_p3, %p2216_p2 }
  0x26   : > { %p2223_p11 = por %p2222_p10, %p2221_p9 }
  0x27   : > { %p2219_p8 = pneg %p2218_p7 }
  0x29   : > { %p2224_p12 = pnand %p2223_p11, %p2219_p8 }
  0x2b   : > { %2227 = shalt.err (!%p2224_p12)
}
  0x2c   : > { %s2300_s27 = smov 128   ;;  %s2301_s16 = smov 8  }
  0x2d   : > { %2009 = dma.hbm_to_vmem [thread:$0]  (!%p2438_p0), %s324_s17, 32768, %s326_s19, %s313_s22, %s2300_s27, %s2300_s27, %s2301_s16  }
  0x2e   : > { %337 = sbr.rel (%p2383_p6) target bundleno = 865 (0x361), region = 52 }
  0x33   : > { %2260 = dma.done.wait (%p134_p1), [#allocation4], 128  }
  0x34   : > { %2262 = vsyncadd (%p134_p1), [#allocation4], 4294967168 }
  0x35   : > { %2264 = dma.done.wait (%p134_p1), [#allocation6], 320  }
  0x36   : > { %2266 = vsyncadd (%p134_p1), [#allocation6], 4294966976  ;;  %s354_s20 = sand.u32 1, %s2367_s9   ;;  %s356_s17 = sand.u32 1, %s2285_s28  }
  0x37   : > { %s1696_s18 = sshll.u32 %s356_s17, 11  ;;  %s355_s14 = scalar_lea.sflag [#allocation9], %s354_s20 }
  0x38   : > { %s2464_s19 = scalar_lea.vmem [#allocation8], %s1696_s18 }
  0x39   : > { %2268 = dma.done.wait (%p2376_p5), %s355_s14, 32768  }
  0x3a   : > { %2270 = vsyncadd (%p2376_p5), %s355_s14, 4294934528 }
  0x3b   : > { %2272 = dma.done.wait (%p134_p1), [#allocation9], 16  }
  0x3c   : > { %2274 = vsyncadd (%p134_p1), [#allocation9], 4294967280 }
  0x3d   : > { %2276 = dma.done.wait (%p134_p1), [#allocation12], 16  }
  0x3e   : > { %2278 = vsyncadd (%p134_p1), [#allocation12], 4294967280  ;;  %p402_p6 = scmp.lt.s32.totalorder %s2367_s9, 3 }
  0x3f   : > { %411 = sbr.rel (%p1682_p4) target bundleno = 70 (0x46), region = 80 }
  0x40   : > { %s403_s21 = scalar_select %p402_p6, %s2367_s9, 3 }
  0x42   : > { %s1967_s22 = sshll.u32 %s403_s21, 7 }
  0x43   : > { %s2483_s25 = scalar_lea.vmem %s3116_s0, %s1967_s22 }
  0x44   : > { %v2302_v0 = vmov 0.0  }
  0x45   : > { %412 = vst [vmem:[#allocation2] sm:$0x3] %v2302_v0 }
  0x46 PF: > { %v429_v1 = vld [vmem:[#allocation5] sm:$0xff]  ;;  %v430_v2 = vld [vmem:[#allocation5 + $0x8] sm:$0xff]  ;;  %vm499_vm0 = vcmask 1043456   ;;  %vm450_vm1 = vcmask 31744   ;;  %v414_v8 = vld [vmem:[%s2483_s25 + $0x8] sm:$0xff]  ;;  %p1962_p1 = scmp.ne.s32.totalorder %s2367_s9, 3 }
  0x47   : > { %443 = vst [vmem:[#allocation1] ss:$2 sm:$0xff] %v429_v1  ;;  %v413_v3 = vld [vmem:[%s2483_s25] sm:$0xff]  ;;  %v415_v9 = vld [vmem:[%s2483_s25 + $0x10] sm:$0xff]  ;;  %v416_v10 = vld [vmem:[%s2483_s25 + $0x18] sm:$0xff] }
  0x48   : > { %445 = vst [vmem:[#allocation1 + $0x10] ss:$2 sm:$0xff] %v430_v2  ;;  %v417_v11 = vld [vmem:[%s2483_s25 + $0x20] sm:$0xff]  ;;  %v418_v12 = vld [vmem:[%s2483_s25 + $0x28] sm:$0xff]  ;;  %v419_v13 = vld [vmem:[%s2483_s25 + $0x30] sm:$0xff] }
  0x49   : > { %v420_v14 = vld [vmem:[%s2483_s25 + $0x38] sm:$0xff]  ;;  %v421_v15 = vld [vmem:[%s2483_s25 + $0x40] sm:$0xff]  ;;  %v422_v16 = vld [vmem:[%s2483_s25 + $0x48] sm:$0xff] }
  0x4a   : > { %v423_v17 = vld [vmem:[%s2483_s25 + $0x50] sm:$0xff]  ;;  %v424_v18 = vld [vmem:[%s2483_s25 + $0x58] sm:$0xff]  ;;  %v425_v19 = vld [vmem:[%s2483_s25 + $0x60] sm:$0xff] }
  0x4b   : > { %v426_v20 = vld [vmem:[%s2483_s25 + $0x68] sm:$0xff]  ;;  %v427_v21 = vld [vmem:[%s2483_s25 + $0x70] sm:$0xff]  ;;  %v428_v22 = vld [vmem:[%s2483_s25 + $0x78] sm:$0xff] }
  0x4e   : > { %v446_v4 = vld.sshfl [vmem:[#allocation1] sm:$0xff pattern:$0x75316420]  ;;  %v447_v5 = vld.sshfl [vmem:[#allocation1 + $0x8] sm:$0xff pattern:$0x75316420] }
  0x4f   : > { %1702 = vmatpush.msk.msra.mxu0 %vm499_vm0, %v446_v4  ;;  %1719 = vmatpush.msk.msra.mxu1 %vm499_vm0, %v447_v5  ;;  %v448_v6 = vld.sshfl [vmem:[#allocation1 + $0x10] sm:$0xff pattern:$0x75316420]  ;;  %v449_v7 = vld.sshfl [vmem:[#allocation1 + $0x18] sm:$0xff pattern:$0x75316420] }
  0x50   : > { %1736 = vmatpush.msk.msra.mxu2 %vm499_vm0, %v448_v6  ;;  %1753 = vmatpush.msk.msra.mxu3 %vm499_vm0, %v449_v7 }
  0x51   : > { %1703 = vmatmul.msk.f32.vlgmr.msra.gmra.mxu0 %vm450_vm1, %v413_v3  ;;  %1720 = vmatmul.msk.f32.vlgmr.msra.gmra.mxu1 %vm450_vm1, %v413_v3 }
  0x52   : > { %1737 = vmatmul.msk.f32.vlgmr.msra.gmra.mxu2 %vm450_vm1, %v413_v3  ;;  %1754 = vmatmul.msk.f32.vlgmr.msra.gmra.mxu3 %vm450_vm1, %v413_v3 }
  0x59   : > { %1704 = vmatmul.msk.f32.gmra.mxu0 %vm450_vm1, %v414_v8  ;;  %1721 = vmatmul.msk.f32.gmra.mxu1 %vm450_vm1, %v414_v8 }
  0x5a   : > { %1738 = vmatmul.msk.f32.gmra.mxu2 %vm450_vm1, %v414_v8  ;;  %1755 = vmatmul.msk.f32.gmra.mxu3 %vm450_vm1, %v414_v8 }
  0x61   : > { %1705 = vmatmul.msk.f32.gmra.mxu0 %vm450_vm1, %v415_v9  ;;  %1722 = vmatmul.msk.f32.gmra.mxu1 %vm450_vm1, %v415_v9 }
  0x62   : > { %1739 = vmatmul.msk.f32.gmra.mxu2 %vm450_vm1, %v415_v9  ;;  %1756 = vmatmul.msk.f32.gmra.mxu3 %vm450_vm1, %v415_v9 }
  0x69   : > { %1706 = vmatmul.msk.f32.gmra.mxu0 %vm450_vm1, %v416_v10  ;;  %1723 = vmatmul.msk.f32.gmra.mxu1 %vm450_vm1, %v416_v10 }
  0x6a   : > { %1740 = vmatmul.msk.f32.gmra.mxu2 %vm450_vm1, %v416_v10  ;;  %1757 = vmatmul.msk.f32.gmra.mxu3 %vm450_vm1, %v416_v10 }
  0x71   : > { %1707 = vmatmul.msk.f32.gmra.mxu0 %vm450_vm1, %v417_v11  ;;  %1724 = vmatmul.msk.f32.gmra.mxu1 %vm450_vm1, %v417_v11 }
  0x72   : > { %1741 = vmatmul.msk.f32.gmra.mxu2 %vm450_vm1, %v417_v11  ;;  %1758 = vmatmul.msk.f32.gmra.mxu3 %vm450_vm1, %v417_v11 }
  0x79   : > { %1708 = vmatmul.msk.f32.gmra.mxu0 %vm450_vm1, %v418_v12  ;;  %1725 = vmatmul.msk.f32.gmra.mxu1 %vm450_vm1, %v418_v12 }
  0x7a   : > { %1742 = vmatmul.msk.f32.gmra.mxu2 %vm450_vm1, %v418_v12  ;;  %1759 = vmatmul.msk.f32.gmra.mxu3 %vm450_vm1, %v418_v12 }
  0x81   : > { %1709 = vmatmul.msk.f32.gmra.mxu0 %vm450_vm1, %v419_v13  ;;  %1726 = vmatmul.msk.f32.gmra.mxu1 %vm450_vm1, %v419_v13 }
  0x82   : > { %1743 = vmatmul.msk.f32.gmra.mxu2 %vm450_vm1, %v419_v13  ;;  %1760 = vmatmul.msk.f32.gmra.mxu3 %vm450_vm1, %v419_v13 }
  0x89   : > { %1710 = vmatmul.msk.f32.gmra.mxu0 %vm450_vm1, %v420_v14  ;;  %1727 = vmatmul.msk.f32.gmra.mxu1 %vm450_vm1, %v420_v14 }
  0x8a   : > { %1744 = vmatmul.msk.f32.gmra.mxu2 %vm450_vm1, %v420_v14  ;;  %1761 = vmatmul.msk.f32.gmra.mxu3 %vm450_vm1, %v420_v14 }
  0x91   : > { %1711 = vmatmul.msk.f32.gmra.mxu0 %vm450_vm1, %v421_v15  ;;  %1728 = vmatmul.msk.f32.gmra.mxu1 %vm450_vm1, %v421_v15 }
  0x92   : > { %1745 = vmatmul.msk.f32.gmra.mxu2 %vm450_vm1, %v421_v15  ;;  %1762 = vmatmul.msk.f32.gmra.mxu3 %vm450_vm1, %v421_v15 }
  0x99   : > { %1712 = vmatmul.msk.f32.gmra.mxu0 %vm450_vm1, %v422_v16  ;;  %1729 = vmatmul.msk.f32.gmra.mxu1 %vm450_vm1, %v422_v16 }
  0x9a   : > { %1746 = vmatmul.msk.f32.gmra.mxu2 %vm450_vm1, %v422_v16  ;;  %1763 = vmatmul.msk.f32.gmra.mxu3 %vm450_vm1, %v422_v16 }
  0xa1   : > { %1713 = vmatmul.msk.f32.gmra.mxu0 %vm450_vm1, %v423_v17  ;;  %1730 = vmatmul.msk.f32.gmra.mxu1 %vm450_vm1, %v423_v17 }
  0xa2   : > { %1747 = vmatmul.msk.f32.gmra.mxu2 %vm450_vm1, %v423_v17  ;;  %1764 = vmatmul.msk.f32.gmra.mxu3 %vm450_vm1, %v423_v17  ;;  %v431_v17 = vld [vmem:[#allocation7] sm:$0xf] }
  0xa9   : > { %1714 = vmatmul.msk.f32.gmra.mxu0 %vm450_vm1, %v424_v18  ;;  %1731 = vmatmul.msk.f32.gmra.mxu1 %vm450_vm1, %v424_v18 }
  0xaa   : > { %1748 = vmatmul.msk.f32.gmra.mxu2 %vm450_vm1, %v424_v18  ;;  %1765 = vmatmul.msk.f32.gmra.mxu3 %vm450_vm1, %v424_v18  ;;  %v2655_v18 = vperm.slane %v431_v17, 0 }
  0xb1   : > { %1715 = vmatmul.msk.f32.gmra.mxu0 %vm450_vm1, %v425_v19  ;;  %1732 = vmatmul.msk.f32.gmra.mxu1 %vm450_vm1, %v425_v19 }
  0xb2   : > { %1749 = vmatmul.msk.f32.gmra.mxu2 %vm450_vm1, %v425_v19  ;;  %1766 = vmatmul.msk.f32.gmra.mxu3 %vm450_vm1, %v425_v19  ;;  %v2657_v19 = vperm.slane %v431_v17, 1 }
  0xb9   : > { %1716 = vmatmul.msk.f32.gmra.mxu0 %vm450_vm1, %v426_v20  ;;  %1733 = vmatmul.msk.f32.gmra.mxu1 %vm450_vm1, %v426_v20 }
  0xba   : > { %1750 = vmatmul.msk.f32.gmra.mxu2 %vm450_vm1, %v426_v20  ;;  %1767 = vmatmul.msk.f32.gmra.mxu3 %vm450_vm1, %v426_v20 }
  0xc1   : > { %1717 = vmatmul.msk.f32.gmra.mxu0 %vm450_vm1, %v427_v21  ;;  %1734 = vmatmul.msk.f32.gmra.mxu1 %vm450_vm1, %v427_v21 }
  0xc2   : > { %1751 = vmatmul.msk.f32.gmra.mxu2 %vm450_vm1, %v427_v21  ;;  %1768 = vmatmul.msk.f32.gmra.mxu3 %vm450_vm1, %v427_v21 }
  0xc9   : > { %1718 = vmatmul.msk.f32.gmra.mxu0 %vm450_vm1, %v428_v22  ;;  %1735 = vmatmul.msk.f32.gmra.mxu1 %vm450_vm1, %v428_v22 }
  0xca   : > { %1752 = vmatmul.msk.f32.gmra.mxu2 %vm450_vm1, %v428_v22  ;;  %1769 = vmatmul.msk.f32.gmra.mxu3 %vm450_vm1, %v428_v22 }
  0xce   : > { %v2567_v23 = vpop.f32.mrf.mxu0  ;;  %v2569_v24 = vpop.f32.mrf.mxu1 }
  0xcf   : > { %3129 = vst [vmem:[#allocation18_spill] sm:$0xff] %v2567_v23 }
  0xd0   : > { %3130 = vst [vmem:[#allocation19_spill] sm:$0xff] %v2569_v24 }
  0xd5   : > { %v2571_v25 = vpop.f32.mrf.mxu2  ;;  %v2573_v26 = vpop.f32.mrf.mxu3 }
  0xd6   : > { %3131 = vst [vmem:[#allocation20_spill] sm:$0xff] %v2571_v25  ;;  %v2575_v27 = vpop.f32.mrf.mxu0  ;;  %v2577_v28 = vpop.f32.mrf.mxu1 }
  0xd7   : > { %3132 = vst [vmem:[#allocation21_spill] sm:$0xff] %v2573_v26 }
  0xd8   : > { %3133 = vst [vmem:[#allocation22_spill] sm:$0xff] %v2577_v28  ;;  %v2669_v28 = vperm.slane %v431_v17, 3 }
  0xdd   : > { %v2579_v29 = vpop.f32.mrf.mxu2  ;;  %v2581_v30 = vpop.f32.mrf.mxu3 }
  0xde   : > { %3134 = vst [vmem:[#allocation23_spill] sm:$0xff] %v2579_v29  ;;  %v2583_v31 = vpop.f32.mrf.mxu0  ;;  %v2585_v32 = vpop.f32.mrf.mxu1 }
  0xdf   : > { %3135 = vst [vmem:[#allocation24_spill] sm:$0xff] %v2581_v30 }
  0xe5   : > { %v2587_v33 = vpop.f32.mrf.mxu2  ;;  %v2589_v34 = vpop.f32.mrf.mxu3 }
  0xe6   : > { %3136 = vst [vmem:[#allocation25_spill] sm:$0xff] %v2587_v33  ;;  %v2591_v35 = vpop.f32.mrf.mxu0  ;;  %v2593_v36 = vpop.f32.mrf.mxu1 }
  0xe7   : > { %3137 = vst [vmem:[#allocation26_spill] sm:$0xff] %v2589_v34 }
  0xed   : > { %v2595_v37 = vpop.f32.mrf.mxu2  ;;  %v2597_v38 = vpop.f32.mrf.mxu3 }
  0xee   : > { %3138 = vst [vmem:[#allocation27_spill] sm:$0xff] %v2595_v37  ;;  %v2599_v39 = vpop.f32.mrf.mxu0  ;;  %v2601_v40 = vpop.f32.mrf.mxu1 }
  0xef   : > { %3139 = vst [vmem:[#allocation28_spill] sm:$0xff] %v2597_v38 }
  0xf5   : > { %v2603_v41 = vpop.f32.mrf.mxu2  ;;  %v2605_v42 = vpop.f32.mrf.mxu3 }
  0xf6   : > { %3140 = vst [vmem:[#allocation29_spill] sm:$0xff] %v2603_v41  ;;  %v2607_v43 = vpop.f32.mrf.mxu0  ;;  %v2609_v44 = vpop.f32.mrf.mxu1  ;;  %v2667_v41 = vperm.slane %v431_v17, 2 }
  0xf7   : > { %3141 = vst [vmem:[#allocation30_spill] sm:$0xff] %v2605_v42 }
  0xfd   : > { %v2611_v45 = vpop.f32.mrf.mxu2  ;;  %v2613_v46 = vpop.f32.mrf.mxu3 }
  0xfe   : > { %v2615_v47 = vpop.f32.mrf.mxu0  ;;  %v2617_v48 = vpop.f32.mrf.mxu1 }
 0x105   : > { %v2619_v49 = vpop.f32.mrf.mxu2  ;;  %v2621_v50 = vpop.f32.mrf.mxu3 }
 0x106   : > { %v2623_v51 = vpop.f32.mrf.mxu0  ;;  %v2625_v52 = vpop.f32.mrf.mxu1 }
 0x10d   : > { %v2627_v53 = vpop.f32.mrf.mxu2  ;;  %v2629_v54 = vpop.f32.mrf.mxu3 }
 0x10e   : > { %v2631_v55 = vpop.f32.mrf.mxu0  ;;  %v2633_v56 = vpop.f32.mrf.mxu1 }
 0x115   : > { %v2635_v57 = vpop.f32.mrf.mxu2  ;;  %v2637_v58 = vpop.f32.mrf.mxu3 }
 0x116   : > { %v2639_v59 = vpop.f32.mrf.mxu0  ;;  %v2641_v60 = vpop.f32.mrf.mxu1 }
 0x117   : > { %v618_v17 = vadd.f32 %v2641_v60, %v2657_v19 }
 0x11d   : > { %v2643_v61 = vpop.f32.mrf.mxu2  ;;  %v2645_v62 = vpop.f32.mrf.mxu3 }
 0x11e   : > { %v555_v63 = vpop.f32.mrf.mxu0  ;;  %v620_v0 = vpop.f32.mrf.mxu1 }
 0x125   : > { %v2647_v1 = vpop.f32.mrf.mxu2  ;;  %v2649_v2 = vpop.f32.mrf.mxu3 }
 0x126   : > { %v558_v3 = vpop.f32.mrf.mxu0  ;;  %v623_v4 = vpop.f32.mrf.mxu1 }
 0x12d   : > { %v2651_v5 = vpop.f32.mrf.mxu2  ;;  %v2653_v6 = vpop.f32.mrf.mxu3 }
 0x12e   : > { %v561_v7 = vpop.f32.mrf.mxu0  ;;  %v626_v8 = vpop.f32.mrf.mxu1 }
 0x135   : > { %v691_v9 = vpop.f32.mrf.mxu2  ;;  %v756_v10 = vpop.f32.mrf.mxu3 }
 0x136   : > { %v564_v11 = vpop.f32.mrf.mxu0  ;;  %v629_v12 = vpop.f32.mrf.mxu1 }
 0x137   : > { %v565_v33 = vadd.f32 %v564_v11, %v2655_v18  ;;  %v630_v38 = vadd.f32 %v629_v12, %v2657_v19 }
 0x139   : > { %v820_v11 = vmax.f32 %v565_v33, 0.0  ;;  %v821_v12 = vmax.f32 %v630_v38, 0.0 }
 0x13d   : > { %v694_v13 = vpop.f32.mrf.mxu2  ;;  %v759_v14 = vpop.f32.mrf.mxu3 }
 0x13e   : > { %v567_v15 = vpop.f32.mrf.mxu0  ;;  %v632_v16 = vpop.f32.mrf.mxu1  ;;  %v695_v33 = vadd.f32 %v694_v13, %v2667_v41 }
 0x13f   : > { %v568_v20 = vadd.f32 %v567_v15, %v2655_v18  ;;  %v633_v21 = vadd.f32 %v632_v16, %v2657_v19  ;;  %v562_v15 = vadd.f32 %v561_v7, %v2655_v18  ;;  %v627_v16 = vadd.f32 %v626_v8, %v2657_v19 }
 0x140   : > { %v556_v7 = vadd.f32 %v555_v63, %v2655_v18 }
 0x141   : > { %v824_v37 = vmax.f32 %v568_v20, 0.0  ;;  %v825_v24 = vmax.f32 %v633_v21, 0.0  ;;  %v816_v8 = vmax.f32 %v562_v15, 0.0  ;;  %v757_v15 = vadd.f32 %v756_v10, %v2669_v28 }
 0x142   : > { %v822_v10 = vmax.f32 %v695_v33, 0.0 }
 0x145   : > { %v697_v22 = vpop.f32.mrf.mxu2  ;;  %v762_v26 = vpop.f32.mrf.mxu3 }
 0x146   : > { %v570_v25 = vpop.f32.mrf.mxu0  ;;  %v635_v30 = vpop.f32.mrf.mxu1 }
 0x147   : > { %v571_v29 = vadd.f32 %v570_v25, %v2655_v18  ;;  %v636_v34 = vadd.f32 %v635_v30, %v2657_v19  ;;  %v559_v25 = vadd.f32 %v558_v3, %v2655_v18  ;;  %v624_v30 = vadd.f32 %v623_v4, %v2657_v19 }
 0x148   : > { %v621_v3 = vadd.f32 %v620_v0, %v2657_v19  ;;  %v817_v4 = vmax.f32 %v627_v16, 0.0  ;;  %v692_v0 = vadd.f32 %v691_v9, %v2667_v41  ;;  %v754_v9 = vadd.f32 %v2653_v6, %v2669_v28 }
 0x149   : > { %v828_v23 = vmax.f32 %v571_v29, 0.0  ;;  %v829_v42 = vmax.f32 %v636_v34, 0.0  ;;  %v698_v29 = vadd.f32 %v697_v22, %v2667_v41  ;;  %v763_v34 = vadd.f32 %v762_v26, %v2669_v28 }
 0x14a   : > { %v553_v26 = vadd.f32 %v2639_v59, %v2655_v18  ;;  %v812_v22 = vmax.f32 %v559_v25, 0.0  ;;  %v813_v63 = vmax.f32 %v624_v30, 0.0  ;;  %v615_v59 = vadd.f32 %v2633_v56, %v2657_v19 }
 0x14b   : > { %833 = vmatpush.msrb.mxu0 %v828_v23  ;;  %853 = vmatpush.msrb.mxu1 %v829_v42  ;;  %v826_v16 = vmax.f32 %v698_v29, 0.0  ;;  %v827_v13 = vmax.f32 %v763_v34, 0.0  ;;  %v809_v60 = vmax.f32 %v621_v3, 0.0  ;;  %v689_v25 = vadd.f32 %v2651_v5, %v2667_v41 }
 0x14c   : > { %v612_v56 = vadd.f32 %v2625_v52, %v2657_v19  ;;  %v686_v5 = vadd.f32 %v2647_v1, %v2667_v41  ;;  %v751_v6 = vadd.f32 %v2649_v2, %v2669_v28  ;;  %v819_v29 = vmax.f32 %v757_v15, 0.0 }
 0x14d   : > { %v700_v20 = vpop.f32.mrf.mxu2  ;;  %v765_v21 = vpop.f32.mrf.mxu3  ;;  %834 = vmatpush.msrb.mxu0 %v824_v37  ;;  %854 = vmatpush.msrb.mxu1 %v825_v24  ;;  %v760_v24 = vadd.f32 %v759_v14, %v2669_v28  ;;  %v550_v14 = vadd.f32 %v2631_v55, %v2655_v18  ;;  %v547_v55 = vadd.f32 %v2623_v51, %v2655_v18 }
 0x14e   : > { %v701_v23 = vadd.f32 %v700_v20, %v2667_v41  ;;  %v766_v42 = vadd.f32 %v765_v21, %v2669_v28  ;;  %v805_v20 = vmax.f32 %v618_v17, 0.0  ;;  %v818_v21 = vmax.f32 %v692_v0, 0.0 }
 0x14f   : > { %835 = vmatpush.msrb.mxu0 %v820_v11  ;;  %855 = vmatpush.msrb.mxu1 %v821_v12  ;;  %v808_v11 = vmax.f32 %v556_v7, 0.0  ;;  %v823_v30 = vmax.f32 %v760_v24, 0.0  ;;  %v804_v12 = vmax.f32 %v553_v26, 0.0  ;;  %v544_v51 = vadd.f32 %v2615_v47, %v2655_v18 }
 0x150   : > { %v830_v37 = vmax.f32 %v701_v23, 0.0  ;;  %v831_v38 = vmax.f32 %v766_v42, 0.0  ;;  %v609_v52 = vadd.f32 %v2617_v48, %v2657_v19  ;;  %v800_v34 = vmax.f32 %v550_v14, 0.0 }
 0x151   : > { %836 = vmatpush.msrb.mxu0 %v816_v8  ;;  %856 = vmatpush.msrb.mxu1 %v817_v4  ;;  %v801_v23 = vmax.f32 %v615_v59, 0.0  ;;  %v683_v1 = vadd.f32 %v2643_v61, %v2667_v41  ;;  %v748_v2 = vadd.f32 %v2645_v62, %v2669_v28  ;;  %v814_v42 = vmax.f32 %v689_v25, 0.0  ;;  %v3142_v59 = vld [vmem:[#allocation22_spill] sm:$0xff]  ;;  %v3143_v25 = vld [vmem:[#allocation29_spill] sm:$0xff] }
 0x152   : > { %873 = vmatpush.msrb.mxu2 %v830_v37  ;;  %893 = vmatpush.msrb.mxu3 %v831_v38  ;;  %v815_v7 = vmax.f32 %v754_v9, 0.0  ;;  %v541_v47 = vadd.f32 %v2607_v43, %v2655_v18  ;;  %v606_v48 = vadd.f32 %v2609_v44, %v2657_v19  ;;  %v796_v3 = vmax.f32 %v547_v55, 0.0  ;;  %v3144_v9 = vld [vmem:[#allocation30_spill] sm:$0xff] }
 0x153   : > { %837 = vmatpush.msrb.mxu0 %v812_v22  ;;  %857 = vmatpush.msrb.mxu1 %v813_v63  ;;  %v797_v8 = vmax.f32 %v612_v56, 0.0  ;;  %v680_v61 = vadd.f32 %v2635_v57, %v2667_v41  ;;  %v745_v62 = vadd.f32 %v2637_v58, %v2669_v28  ;;  %v810_v4 = vmax.f32 %v686_v5, 0.0  ;;  %v3145_v55 = vld [vmem:[#allocation18_spill] sm:$0xff]  ;;  %v3146_v56 = vld [vmem:[#allocation19_spill] sm:$0xff] }
 0x154   : > { %874 = vmatpush.msrb.mxu2 %v826_v16  ;;  %894 = vmatpush.msrb.mxu3 %v827_v13  ;;  %v811_v33 = vmax.f32 %v751_v6, 0.0  ;;  %v538_v43 = vadd.f32 %v2599_v39, %v2655_v18  ;;  %v603_v44 = vadd.f32 %v2601_v40, %v2657_v19  ;;  %v792_v24 = vmax.f32 %v544_v51, 0.0  ;;  %v3147_v6 = vld [vmem:[#allocation27_spill] sm:$0xff] }
 0x155   : > { %838 = vmatpush.msrb.mxu0 %v808_v11  ;;  %858 = vmatpush.msrb.mxu1 %v809_v60  ;;  %v793_v37 = vmax.f32 %v609_v52, 0.0  ;;  %v677_v57 = vadd.f32 %v2627_v53, %v2667_v41  ;;  %v742_v58 = vadd.f32 %v2629_v54, %v2669_v28  ;;  %v806_v38 = vmax.f32 %v683_v1, 0.0 }
 0x156   : > { %875 = vmatpush.msrb.mxu2 %v822_v10  ;;  %895 = vmatpush.msrb.mxu3 %v823_v30  ;;  %v807_v26 = vmax.f32 %v748_v2, 0.0  ;;  %v535_v39 = vadd.f32 %v2591_v35, %v2655_v18  ;;  %v600_v40 = vadd.f32 %v2593_v36, %v2657_v19  ;;  %v788_v17 = vmax.f32 %v541_v47, 0.0  ;;  %v3150_v2 = vld [vmem:[#allocation26_spill] sm:$0xff] }
 0x157   : > { %839 = vmatpush.msrb.mxu0 %v804_v12  ;;  %859 = vmatpush.msrb.mxu1 %v805_v20  ;;  %v789_v22 = vmax.f32 %v606_v48, 0.0  ;;  %v674_v53 = vadd.f32 %v2619_v49, %v2667_v41  ;;  %v739_v54 = vadd.f32 %v2621_v50, %v2669_v28  ;;  %v802_v63 = vmax.f32 %v680_v61, 0.0 }
 0x158   : > { %876 = vmatpush.msrb.mxu2 %v818_v21  ;;  %896 = vmatpush.msrb.mxu3 %v819_v29  ;;  %v803_v0 = vmax.f32 %v745_v62, 0.0  ;;  %v532_v35 = vadd.f32 %v2583_v31, %v2655_v18  ;;  %v597_v36 = vadd.f32 %v2585_v32, %v2657_v19  ;;  %v784_v15 = vmax.f32 %v538_v43, 0.0  ;;  %v3148_v29 = vld [vmem:[#allocation28_spill] sm:$0xff] }
 0x159   : > { %840 = vmatpush.msrb.mxu0 %v800_v34  ;;  %860 = vmatpush.msrb.mxu1 %v801_v23  ;;  %v785_v16 = vmax.f32 %v603_v44, 0.0  ;;  %v671_v49 = vadd.f32 %v2611_v45, %v2667_v41  ;;  %v736_v50 = vadd.f32 %v2613_v46, %v2669_v28  ;;  %v798_v13 = vmax.f32 %v677_v57, 0.0  ;;  %v3152_v62 = vld [vmem:[#allocation24_spill] sm:$0xff]  ;;  %v832_v44 = vld [vmem:[#allocation3] sm:$0xff]  ;;  %v3154_v57 = vld [vmem:[#allocation21_spill] sm:$0xff] }
 0x15a   : > { %877 = vmatpush.msrb.mxu2 %v814_v42  ;;  %897 = vmatpush.msrb.mxu3 %v815_v7  ;;  %v799_v14 = vmax.f32 %v742_v58, 0.0  ;;  %v529_v31 = vadd.f32 %v2575_v27, %v2655_v18  ;;  %v594_v32 = vadd.f32 %v3142_v59, %v2657_v19  ;;  %v780_v11 = vmax.f32 %v535_v39, 0.0  ;;  %v929_v39 = vld [vmem:[%s2464_s19 + $0x78] sm:$0xff] }
 0x15b   : > { %841 = vmatpush.msrb.mxu0 %v796_v3  ;;  %861 = vmatpush.msrb.mxu1 %v797_v8  ;;  %v781_v60 = vmax.f32 %v600_v40, 0.0  ;;  %v668_v45 = vadd.f32 %v3143_v25, %v2667_v41  ;;  %v733_v46 = vadd.f32 %v3144_v9, %v2669_v28  ;;  %v794_v10 = vmax.f32 %v674_v53, 0.0  ;;  %v3151_v8 = vld [vmem:[#allocation23_spill] sm:$0xff]  ;;  %v945_v40 = vld [vmem:[%s2464_s19 + $0xf8] sm:$0xff] }
 0x15c   : > { %878 = vmatpush.msrb.mxu2 %v810_v4  ;;  %898 = vmatpush.msrb.mxu3 %v811_v33  ;;  %v795_v30 = vmax.f32 %v739_v54, 0.0  ;;  %v526_v27 = vadd.f32 %v3145_v55, %v2655_v18  ;;  %v591_v12 = vadd.f32 %v3146_v56, %v2657_v19  ;;  %v776_v20 = vmax.f32 %v532_v35, 0.0  ;;  %v3149_v18 = vld [vmem:[#allocation25_spill] sm:$0xff]  ;;  %v944_v53 = vld [vmem:[%s2464_s19 + $0xf0] sm:$0xff]  ;;  %v927_v35 = vld [vmem:[%s2464_s19 + $0x68] sm:$0xff] }
 0x15d   : > { %842 = vmatpush.msrb.mxu0 %v792_v24  ;;  %862 = vmatpush.msrb.mxu1 %v793_v37  ;;  %v777_v5 = vmax.f32 %v597_v36, 0.0  ;;  %v665_v21 = vadd.f32 %v3147_v6, %v2667_v41  ;;  %v730_v51 = vadd.f32 %v3148_v29, %v2669_v28  ;;  %v790_v52 = vmax.f32 %v671_v49, 0.0  ;;  %v3153_v24 = vld [vmem:[#allocation20_spill] sm:$0xff]  ;;  %v943_v36 = vld [vmem:[%s2464_s19 + $0xe8] sm:$0xff]  ;;  %v926_v49 = vld [vmem:[%s2464_s19 + $0x60] sm:$0xff] }
 0x15e   : > { %879 = vmatpush.msrb.mxu2 %v806_v38  ;;  %899 = vmatpush.msrb.mxu3 %v807_v26  ;;  %v791_v34 = vmax.f32 %v736_v50, 0.0  ;;  %v772_v23 = vmax.f32 %v529_v31, 0.0  ;;  %v773_v1 = vmax.f32 %v594_v32, 0.0  ;;  %v662_v19 = vadd.f32 %v3149_v18, %v2667_v41  ;;  %v942_v50 = vld [vmem:[%s2464_s19 + $0xe0] sm:$0xff]  ;;  %v925_v31 = vld [vmem:[%s2464_s19 + $0x58] sm:$0xff]  ;;  %v940_v25 = vld [vmem:[%s2464_s19 + $0xd0] sm:$0xff] }
 0x15f   : > { %843 = vmatpush.msrb.mxu0 %v788_v17  ;;  %863 = vmatpush.msrb.mxu1 %v789_v22  ;;  %v727_v42 = vadd.f32 %v3150_v2, %v2669_v28  ;;  %v786_v7 = vmax.f32 %v668_v45, 0.0  ;;  %v787_v47 = vmax.f32 %v733_v46, 0.0  ;;  %v768_v48 = vmax.f32 %v526_v27, 0.0  ;;  %v941_v59 = vld [vmem:[%s2464_s19 + $0xd8] sm:$0xff]  ;;  %v958_v32 = vld [vmem:[%s2464_s19 + $0x160] sm:$0xff]  ;;  %v923_v46 = vld [vmem:[%s2464_s19 + $0x48] sm:$0xff] }
 0x160   : > { %880 = vmatpush.msrb.mxu2 %v802_v63  ;;  %900 = vmatpush.msrb.mxu3 %v803_v0  ;;  %v769_v3 = vmax.f32 %v591_v12, 0.0  ;;  %v659_v61 = vadd.f32 %v3151_v8, %v2667_v41  ;;  %v724_v4 = vadd.f32 %v3152_v62, %v2669_v28  ;;  %v782_v33 = vmax.f32 %v665_v21, 0.0  ;;  %v961_v63 = vld [vmem:[%s2464_s19 + $0x178] sm:$0xff]  ;;  %v972_v55 = vld [vmem:[%s2464_s19 + $0x1d0] sm:$0xff]  ;;  %v922_v27 = vld [vmem:[%s2464_s19 + $0x40] sm:$0xff] }
 0x161   : > { %844 = vmatpush.msrb.mxu0 %v784_v15  ;;  %864 = vmatpush.msrb.mxu1 %v785_v16  ;;  %v783_v43 = vmax.f32 %v730_v51, 0.0  ;;  %v656_v37 = vadd.f32 %v3153_v24, %v2667_v41  ;;  %v721_v58 = vadd.f32 %v3154_v57, %v2669_v28  ;;  %v778_v38 = vmax.f32 %v662_v19, 0.0  ;;  %v928_v41 = vld [vmem:[%s2464_s19 + $0x70] sm:$0xff]  ;;  %v977_v0 = vld [vmem:[%s2464_s19 + $0x1f8] sm:$0xff]  ;;  %v938_v56 = vld [vmem:[%s2464_s19 + $0xc0] sm:$0xff] }
 0x162   : > { %881 = vmatpush.msrb.mxu2 %v798_v13  ;;  %901 = vmatpush.msrb.mxu3 %v799_v14  ;;  %v779_v26 = vmax.f32 %v727_v42, 0.0  ;;  %v774_v17 = vmax.f32 %v659_v61, 0.0  ;;  %v775_v22 = vmax.f32 %v724_v4, 0.0  ;;  %v960_v15 = vld [vmem:[%s2464_s19 + $0x170] sm:$0xff]  ;;  %v959_v13 = vld [vmem:[%s2464_s19 + $0x168] sm:$0xff]  ;;  %v957_v45 = vld [vmem:[%s2464_s19 + $0x158] sm:$0xff] }
 0x163   : > { %845 = vmatpush.msrb.mxu0 %v780_v11  ;;  %865 = vmatpush.msrb.mxu1 %v781_v60  ;;  %v770_v28 = vmax.f32 %v656_v37, 0.0  ;;  %v771_v54 = vmax.f32 %v721_v58, 0.0  ;;  %v976_v16 = vld [vmem:[%s2464_s19 + $0x1f0] sm:$0xff]  ;;  %v975_v14 = vld [vmem:[%s2464_s19 + $0x1e8] sm:$0xff]  ;;  %v974_v11 = vld [vmem:[%s2464_s19 + $0x1e0] sm:$0xff] }
 0x164   : > { %882 = vmatpush.msrb.mxu2 %v794_v10  ;;  %902 = vmatpush.msrb.mxu3 %v795_v30  ;;  %v924_v60 = vld [vmem:[%s2464_s19 + $0x50] sm:$0xff]  ;;  %v973_v9 = vld [vmem:[%s2464_s19 + $0x1d8] sm:$0xff]  ;;  %v939_v10 = vld [vmem:[%s2464_s19 + $0xc8] sm:$0xff] }
 0x165   : > { %846 = vmatpush.msrb.mxu0 %v776_v20  ;;  %866 = vmatpush.msrb.mxu1 %v777_v5  ;;  %v956_v30 = vld [vmem:[%s2464_s19 + $0x150] sm:$0xff]  ;;  %v955_v12 = vld [vmem:[%s2464_s19 + $0x148] sm:$0xff]  ;;  %v921_v5 = vld [vmem:[%s2464_s19 + $0x38] sm:$0xff] }
 0x166   : > { %883 = vmatpush.msrb.mxu2 %v790_v52  ;;  %903 = vmatpush.msrb.mxu3 %v791_v34  ;;  %v971_v20 = vld [vmem:[%s2464_s19 + $0x1c8] sm:$0xff]  ;;  %v937_v6 = vld [vmem:[%s2464_s19 + $0xb8] sm:$0xff]  ;;  %v954_v21 = vld [vmem:[%s2464_s19 + $0x140] sm:$0xff] }
 0x167   : > { %847 = vmatpush.msrb.mxu0 %v772_v23  ;;  %867 = vmatpush.msrb.mxu1 %v773_v1  ;;  %v970_v29 = vld [vmem:[%s2464_s19 + $0x1c0] sm:$0xff]  ;;  %v920_v51 = vld [vmem:[%s2464_s19 + $0x30] sm:$0xff]  ;;  %v953_v34 = vld [vmem:[%s2464_s19 + $0x138] sm:$0xff] }
 0x168   : > { %884 = vmatpush.msrb.mxu2 %v786_v7  ;;  %904 = vmatpush.msrb.mxu3 %v787_v47  ;;  %v936_v52 = vld [vmem:[%s2464_s19 + $0xb0] sm:$0xff]  ;;  %v969_v23 = vld [vmem:[%s2464_s19 + $0x1b8] sm:$0xff]  ;;  %v919_v1 = vld [vmem:[%s2464_s19 + $0x28] sm:$0xff] }
 0x169   : > { %848 = vmatpush.msrb.mxu0 %v768_v48  ;;  %868 = vmatpush.msrb.mxu1 %v769_v3  ;;  %v935_v18 = vld [vmem:[%s2464_s19 + $0xa8] sm:$0xff]  ;;  %v952_v19 = vld [vmem:[%s2464_s19 + $0x130] sm:$0xff]  ;;  %v918_v42 = vld [vmem:[%s2464_s19 + $0x20] sm:$0xff] }
 0x16a   : > { %885 = vmatpush.msrb.mxu2 %v782_v33  ;;  %905 = vmatpush.msrb.mxu3 %v783_v43  ;;  %v968_v2 = vld [vmem:[%s2464_s19 + $0x1b0] sm:$0xff]  ;;  %v934_v7 = vld [vmem:[%s2464_s19 + $0xa0] sm:$0xff]  ;;  %v951_v47 = vld [vmem:[%s2464_s19 + $0x128] sm:$0xff] }
 0x16b   : > { %849 = vmatmul.f32.vlgmr.msrb.gmra.mxu0 %v832_v44  ;;  %869 = vmatmul.f32.vlgmr.msrb.gmra.mxu1 %v832_v44  ;;  %v967_v48 = vld [vmem:[%s2464_s19 + $0x1a8] sm:$0xff]  ;;  %v917_v3 = vld [vmem:[%s2464_s19 + $0x18] sm:$0xff]  ;;  %v950_v61 = vld [vmem:[%s2464_s19 + $0x120] sm:$0xff] }
 0x16c   : > { %886 = vmatpush.msrb.mxu2 %v778_v38  ;;  %906 = vmatpush.msrb.mxu3 %v779_v26  ;;  %v933_v8 = vld [vmem:[%s2464_s19 + $0x98] sm:$0xff]  ;;  %v966_v62 = vld [vmem:[%s2464_s19 + $0x1a0] sm:$0xff]  ;;  %v916_v4 = vld [vmem:[%s2464_s19 + $0x10] sm:$0xff] }
 0x16d   : > { %978 = vmatpush.msra.mxu0 %v929_v39  ;;  %998 = vmatpush.msra.mxu1 %v945_v40  ;;  %v932_v33 = vld [vmem:[%s2464_s19 + $0x90] sm:$0xff]  ;;  %v949_v43 = vld [vmem:[%s2464_s19 + $0x118] sm:$0xff]  ;;  %v915_v24 = vld [vmem:[%s2464_s19 + $0x8] sm:$0xff] }
 0x16e   : > { %887 = vmatpush.msrb.mxu2 %v774_v17  ;;  %907 = vmatpush.msrb.mxu3 %v775_v22  ;;  %v931_v37 = vld [vmem:[%s2464_s19 + $0x88] sm:$0xff]  ;;  %v948_v57 = vld [vmem:[%s2464_s19 + $0x110] sm:$0xff]  ;;  %v914_v38 = vld [vmem:[%s2464_s19] sm:$0xff] }
 0x16f   : > { %979 = vmatpush.msra.mxu0 %v928_v41  ;;  %999 = vmatpush.msra.mxu1 %v944_v53  ;;  %v964_v58 = vld [vmem:[%s2464_s19 + $0x190] sm:$0xff]  ;;  %v930_v26 = vld [vmem:[%s2464_s19 + $0x80] sm:$0xff]  ;;  %v947_v39 = vld [vmem:[%s2464_s19 + $0x108] sm:$0xff] }
 0x170   : > { %888 = vmatpush.msrb.mxu2 %v770_v28  ;;  %908 = vmatpush.msrb.mxu3 %v771_v54  ;;  %v963_v40 = vld [vmem:[%s2464_s19 + $0x188] sm:$0xff]  ;;  %v1785_v17 = vld [vmem:[%s2464_s19 + $0x278] sm:$0xff]  ;;  %v946_v41 = vld [vmem:[%s2464_s19 + $0x100] sm:$0xff] }
 0x171   : > { %889 = vmatmul.f32.vlgmr.msrb.gmra.mxu2 %v832_v44  ;;  %909 = vmatmul.f32.vlgmr.msrb.gmra.mxu3 %v832_v44  ;;  %v965_v44 = vld [vmem:[%s2464_s19 + $0x198] sm:$0xff]  ;;  %v962_v53 = vld [vmem:[%s2464_s19 + $0x180] sm:$0xff] }
 0x172   : > { %1018 = vmatpush.msra.mxu2 %v961_v63  ;;  %1038 = vmatpush.msra.mxu3 %v977_v0  ;;  %v1801_v22 = vld [vmem:[%s2464_s19 + $0x2f8] sm:$0xff]  ;;  %v1784_v63 = vld [vmem:[%s2464_s19 + $0x270] sm:$0xff] }
 0x173   : > { %980 = vmatpush.msra.mxu0 %v927_v35  ;;  %1000 = vmatpush.msra.mxu1 %v943_v36  ;;  %v1817_v28 = vld [vmem:[%s2464_s19 + $0x378] sm:$0xff]  ;;  %v1800_v0 = vld [vmem:[%s2464_s19 + $0x2f0] sm:$0xff] }
 0x174   : > { %1019 = vmatpush.msra.mxu2 %v960_v15  ;;  %1039 = vmatpush.msra.mxu3 %v976_v16  ;;  %v1833_v54 = vld [vmem:[%s2464_s19 + $0x3f8] sm:$0xff]  ;;  %v1816_v35 = vld [vmem:[%s2464_s19 + $0x370] sm:$0xff]  ;;  %v1783_v15 = vld [vmem:[%s2464_s19 + $0x268] sm:$0xff] }
 0x175   : > { %981 = vmatpush.msra.mxu0 %v926_v49  ;;  %1001 = vmatpush.msra.mxu1 %v942_v50  ;;  %v1832_v36 = vld [vmem:[%s2464_s19 + $0x3f0] sm:$0xff]  ;;  %v1799_v16 = vld [vmem:[%s2464_s19 + $0x2e8] sm:$0xff] }
 0x176   : > { %1020 = vmatpush.msra.mxu2 %v959_v13  ;;  %1040 = vmatpush.msra.mxu3 %v975_v14  ;;  %v1815_v49 = vld [vmem:[%s2464_s19 + $0x368] sm:$0xff]  ;;  %v1782_v13 = vld [vmem:[%s2464_s19 + $0x260] sm:$0xff] }
 0x177   : > { %982 = vmatpush.msra.mxu0 %v925_v31  ;;  %1002 = vmatpush.msra.mxu1 %v941_v59  ;;  %v1831_v50 = vld [vmem:[%s2464_s19 + $0x3e8] sm:$0xff]  ;;  %v1798_v14 = vld [vmem:[%s2464_s19 + $0x2e0] sm:$0xff] }
 0x178   : > { %1021 = vmatpush.msra.mxu2 %v958_v32  ;;  %1041 = vmatpush.msra.mxu3 %v974_v11  ;;  %v1814_v31 = vld [vmem:[%s2464_s19 + $0x360] sm:$0xff]  ;;  %v1781_v32 = vld [vmem:[%s2464_s19 + $0x258] sm:$0xff] }
 0x179   : > { %983 = vmatpush.msra.mxu0 %v924_v60  ;;  %1003 = vmatpush.msra.mxu1 %v940_v25  ;;  %v1830_v59 = vld [vmem:[%s2464_s19 + $0x3e0] sm:$0xff]  ;;  %v1797_v11 = vld [vmem:[%s2464_s19 + $0x2d8] sm:$0xff] }
 0x17a   : > { %1022 = vmatpush.msra.mxu2 %v957_v45  ;;  %1042 = vmatpush.msra.mxu3 %v973_v9  ;;  %v1813_v60 = vld [vmem:[%s2464_s19 + $0x358] sm:$0xff]  ;;  %v1780_v45 = vld [vmem:[%s2464_s19 + $0x250] sm:$0xff] }
 0x17b   : > { %984 = vmatpush.msra.mxu0 %v923_v46  ;;  %1004 = vmatpush.msra.mxu1 %v939_v10  ;;  %v1829_v25 = vld [vmem:[%s2464_s19 + $0x3d8] sm:$0xff]  ;;  %v1796_v9 = vld [vmem:[%s2464_s19 + $0x2d0] sm:$0xff] }
 0x17c   : > { %1023 = vmatpush.msra.mxu2 %v956_v30  ;;  %1043 = vmatpush.msra.mxu3 %v972_v55  ;;  %v1812_v46 = vld [vmem:[%s2464_s19 + $0x350] sm:$0xff]  ;;  %v1779_v30 = vld [vmem:[%s2464_s19 + $0x248] sm:$0xff] }
 0x17d   : > { %985 = vmatpush.msra.mxu0 %v922_v27  ;;  %1005 = vmatpush.msra.mxu1 %v938_v56  ;;  %v1828_v10 = vld [vmem:[%s2464_s19 + $0x3d0] sm:$0xff]  ;;  %v1795_v55 = vld [vmem:[%s2464_s19 + $0x2c8] sm:$0xff] }
 0x17e   : > { %1024 = vmatpush.msra.mxu2 %v955_v12  ;;  %1044 = vmatpush.msra.mxu3 %v971_v20  ;;  %v1811_v27 = vld [vmem:[%s2464_s19 + $0x348] sm:$0xff]  ;;  %v1778_v12 = vld [vmem:[%s2464_s19 + $0x240] sm:$0xff] }
 0x17f   : > { %986 = vmatpush.msra.mxu0 %v921_v5  ;;  %1006 = vmatpush.msra.mxu1 %v937_v6  ;;  %v1827_v56 = vld [vmem:[%s2464_s19 + $0x3c8] sm:$0xff]  ;;  %v1794_v20 = vld [vmem:[%s2464_s19 + $0x2c0] sm:$0xff] }
 0x180   : > { %1025 = vmatpush.msra.mxu2 %v954_v21  ;;  %1045 = vmatpush.msra.mxu3 %v970_v29  ;;  %v1810_v5 = vld [vmem:[%s2464_s19 + $0x340] sm:$0xff]  ;;  %v1777_v21 = vld [vmem:[%s2464_s19 + $0x238] sm:$0xff] }
 0x181   : > { %987 = vmatpush.msra.mxu0 %v920_v51  ;;  %1007 = vmatpush.msra.mxu1 %v936_v52  ;;  %v1826_v6 = vld [vmem:[%s2464_s19 + $0x3c0] sm:$0xff]  ;;  %v1793_v29 = vld [vmem:[%s2464_s19 + $0x2b8] sm:$0xff] }
 0x182   : > { %1026 = vmatpush.msra.mxu2 %v953_v34  ;;  %1046 = vmatpush.msra.mxu3 %v969_v23  ;;  %v1809_v51 = vld [vmem:[%s2464_s19 + $0x338] sm:$0xff]  ;;  %v1776_v34 = vld [vmem:[%s2464_s19 + $0x230] sm:$0xff] }
 0x183   : > { %988 = vmatpush.msra.mxu0 %v919_v1  ;;  %1008 = vmatpush.msra.mxu1 %v935_v18  ;;  %v1825_v52 = vld [vmem:[%s2464_s19 + $0x3b8] sm:$0xff]  ;;  %v1792_v23 = vld [vmem:[%s2464_s19 + $0x2b0] sm:$0xff] }
 0x184   : > { %1027 = vmatpush.msra.mxu2 %v952_v19  ;;  %1047 = vmatpush.msra.mxu3 %v968_v2  ;;  %v1808_v1 = vld [vmem:[%s2464_s19 + $0x330] sm:$0xff]  ;;  %v1775_v19 = vld [vmem:[%s2464_s19 + $0x228] sm:$0xff] }
 0x185   : > { %989 = vmatpush.msra.mxu0 %v918_v42  ;;  %1009 = vmatpush.msra.mxu1 %v934_v7  ;;  %v1824_v18 = vld [vmem:[%s2464_s19 + $0x3b0] sm:$0xff]  ;;  %v1791_v2 = vld [vmem:[%s2464_s19 + $0x2a8] sm:$0xff] }
 0x186   : > { %1028 = vmatpush.msra.mxu2 %v951_v47  ;;  %1048 = vmatpush.msra.mxu3 %v967_v48  ;;  %v1807_v42 = vld [vmem:[%s2464_s19 + $0x328] sm:$0xff]  ;;  %v1774_v47 = vld [vmem:[%s2464_s19 + $0x220] sm:$0xff] }
 0x187   : > { %990 = vmatpush.msra.mxu0 %v917_v3  ;;  %1010 = vmatpush.msra.mxu1 %v933_v8  ;;  %v1823_v7 = vld [vmem:[%s2464_s19 + $0x3a8] sm:$0xff]  ;;  %v1790_v48 = vld [vmem:[%s2464_s19 + $0x2a0] sm:$0xff] }
 0x188   : > { %1029 = vmatpush.msra.mxu2 %v950_v61  ;;  %1049 = vmatpush.msra.mxu3 %v966_v62  ;;  %v1806_v3 = vld [vmem:[%s2464_s19 + $0x320] sm:$0xff]  ;;  %v1773_v61 = vld [vmem:[%s2464_s19 + $0x218] sm:$0xff] }
 0x189   : > { %991 = vmatpush.msra.mxu0 %v916_v4  ;;  %1011 = vmatpush.msra.mxu1 %v932_v33  ;;  %v1822_v8 = vld [vmem:[%s2464_s19 + $0x3a0] sm:$0xff]  ;;  %v1789_v62 = vld [vmem:[%s2464_s19 + $0x298] sm:$0xff] }
 0x18a   : > { %1030 = vmatpush.msra.mxu2 %v949_v43  ;;  %1050 = vmatpush.msra.mxu3 %v965_v44  ;;  %v1805_v4 = vld [vmem:[%s2464_s19 + $0x318] sm:$0xff]  ;;  %v1804_v43 = vld [vmem:[%s2464_s19 + $0x310] sm:$0xff] }
 0x18b   : > { %992 = vmatpush.msra.mxu0 %v915_v24  ;;  %1012 = vmatpush.msra.mxu1 %v931_v37  ;;  %v1821_v33 = vld [vmem:[%s2464_s19 + $0x398] sm:$0xff]  ;;  %v1820_v44 = vld [vmem:[%s2464_s19 + $0x390] sm:$0xff]  ;;  %v1803_v24 = vld [vmem:[%s2464_s19 + $0x308] sm:$0xff] }
 0x18c   : > { %1031 = vmatpush.msra.mxu2 %v948_v57  ;;  %1051 = vmatpush.msra.mxu3 %v964_v58  ;;  %v1772_v37 = vld [vmem:[%s2464_s19 + $0x210] sm:$0xff]  ;;  %v1771_v58 = vld [vmem:[%s2464_s19 + $0x208] sm:$0xff] }
 0x18d   : > { %993 = vmatpush.msra.mxu0 %v914_v38  ;;  %1013 = vmatpush.msra.mxu1 %v930_v26  ;;  %v1788_v57 = vld [vmem:[%s2464_s19 + $0x290] sm:$0xff]  ;;  %v1787_v38 = vld [vmem:[%s2464_s19 + $0x288] sm:$0xff]  ;;  %v1770_v26 = vld [vmem:[%s2464_s19 + $0x200] sm:$0xff] }
 0x18e   : > { %1032 = vmatpush.msra.mxu2 %v947_v39  ;;  %1052 = vmatpush.msra.mxu3 %v963_v40  ;;  %v1786_v39 = vld [vmem:[%s2464_s19 + $0x280] sm:$0xff]  ;;  %v1819_v40 = vld [vmem:[%s2464_s19 + $0x388] sm:$0xff] }
 0x18f   : > { %1136 = vmatpush.msrb.mxu0 %v1785_v17  ;;  %1156 = vmatpush.msrb.mxu1 %v1801_v22  ;;  %v1802_v17 = vld [vmem:[%s2464_s19 + $0x300] sm:$0xff] }
 0x190   : > { %1033 = vmatpush.msra.mxu2 %v946_v41  ;;  %1053 = vmatpush.msra.mxu3 %v962_v53  ;;  %v1818_v22 = vld [vmem:[%s2464_s19 + $0x380] sm:$0xff]  ;;  %v1849_v41 = vld [vmem:[%s2464_s19 + $0x478] sm:$0xff] }
 0x191   : > { %1137 = vmatpush.msrb.mxu0 %v1784_v63  ;;  %1157 = vmatpush.msrb.mxu1 %v1800_v0  ;;  %v1865_v53 = vld [vmem:[%s2464_s19 + $0x4f8] sm:$0xff]  ;;  %v1848_v63 = vld [vmem:[%s2464_s19 + $0x470] sm:$0xff] }
 0x192   : > { %1176 = vmatpush.msrb.mxu2 %v1817_v28  ;;  %1196 = vmatpush.msrb.mxu3 %v1833_v54  ;;  %v1864_v0 = vld [vmem:[%s2464_s19 + $0x4f0] sm:$0xff] }
 0x193   : > { %1138 = vmatpush.msrb.mxu0 %v1783_v15  ;;  %1158 = vmatpush.msrb.mxu1 %v1799_v16 }
 0x194   : > { %1177 = vmatpush.msrb.mxu2 %v1816_v35  ;;  %1197 = vmatpush.msrb.mxu3 %v1832_v36  ;;  %v1847_v35 = vld [vmem:[%s2464_s19 + $0x468] sm:$0xff] }
 0x195   : > { %1139 = vmatpush.msrb.mxu0 %v1782_v13  ;;  %1159 = vmatpush.msrb.mxu1 %v1798_v14  ;;  %v1863_v36 = vld [vmem:[%s2464_s19 + $0x4e8] sm:$0xff]  ;;  %v1845_v13 = vld [vmem:[%s2464_s19 + $0x458] sm:$0xff] }
 0x196   : > { %1178 = vmatpush.msrb.mxu2 %v1815_v49  ;;  %1198 = vmatpush.msrb.mxu3 %v1831_v50  ;;  %v1846_v49 = vld [vmem:[%s2464_s19 + $0x460] sm:$0xff]  ;;  %v1861_v14 = vld [vmem:[%s2464_s19 + $0x4d8] sm:$0xff] }
 0x197   : > { %1140 = vmatpush.msrb.mxu0 %v1781_v32  ;;  %1160 = vmatpush.msrb.mxu1 %v1797_v11  ;;  %v1862_v50 = vld [vmem:[%s2464_s19 + $0x4e0] sm:$0xff]  ;;  %v1881_v32 = vld [vmem:[%s2464_s19 + $0x578] sm:$0xff] }
 0x198   : > { %1179 = vmatpush.msrb.mxu2 %v1814_v31  ;;  %1199 = vmatpush.msrb.mxu3 %v1830_v59  ;;  %v1844_v31 = vld [vmem:[%s2464_s19 + $0x450] sm:$0xff]  ;;  %v1897_v11 = vld [vmem:[%s2464_s19 + $0x5f8] sm:$0xff] }
 0x199   : > { %1141 = vmatpush.msrb.mxu0 %v1780_v45  ;;  %1161 = vmatpush.msrb.mxu1 %v1796_v9  ;;  %v1860_v59 = vld [vmem:[%s2464_s19 + $0x4d0] sm:$0xff]  ;;  %v1843_v45 = vld [vmem:[%s2464_s19 + $0x448] sm:$0xff] }
 0x19a   : > { %1180 = vmatpush.msrb.mxu2 %v1813_v60  ;;  %1200 = vmatpush.msrb.mxu3 %v1829_v25  ;;  %v1859_v9 = vld [vmem:[%s2464_s19 + $0x4c8] sm:$0xff] }
 0x19b   : > { %1142 = vmatpush.msrb.mxu0 %v1779_v30  ;;  %1162 = vmatpush.msrb.mxu1 %v1795_v55  ;;  %v1842_v30 = vld [vmem:[%s2464_s19 + $0x440] sm:$0xff] }
 0x19c   : > { %1181 = vmatpush.msrb.mxu2 %v1812_v46  ;;  %1201 = vmatpush.msrb.mxu3 %v1828_v10  ;;  %v1880_v46 = vld [vmem:[%s2464_s19 + $0x570] sm:$0xff]  ;;  %v1858_v55 = vld [vmem:[%s2464_s19 + $0x4c0] sm:$0xff] }
 0x19d   : > { %1143 = vmatpush.msrb.mxu0 %v1778_v12  ;;  %1163 = vmatpush.msrb.mxu1 %v1794_v20  ;;  %v1896_v10 = vld [vmem:[%s2464_s19 + $0x5f0] sm:$0xff]  ;;  %v1841_v12 = vld [vmem:[%s2464_s19 + $0x438] sm:$0xff] }
 0x19e   : > { %1182 = vmatpush.msrb.mxu2 %v1811_v27  ;;  %1202 = vmatpush.msrb.mxu3 %v1827_v56  ;;  %v1879_v27 = vld [vmem:[%s2464_s19 + $0x568] sm:$0xff]  ;;  %v1857_v20 = vld [vmem:[%s2464_s19 + $0x4b8] sm:$0xff] }
 0x19f   : > { %1144 = vmatpush.msrb.mxu0 %v1777_v21  ;;  %1164 = vmatpush.msrb.mxu1 %v1793_v29  ;;  %v1895_v56 = vld [vmem:[%s2464_s19 + $0x5e8] sm:$0xff]  ;;  %v1840_v21 = vld [vmem:[%s2464_s19 + $0x430] sm:$0xff] }
 0x1a0   : > { %1183 = vmatpush.msrb.mxu2 %v1810_v5  ;;  %1203 = vmatpush.msrb.mxu3 %v1826_v6  ;;  %v1878_v5 = vld [vmem:[%s2464_s19 + $0x560] sm:$0xff]  ;;  %v1856_v29 = vld [vmem:[%s2464_s19 + $0x4b0] sm:$0xff] }
 0x1a1   : > { %1145 = vmatpush.msrb.mxu0 %v1776_v34  ;;  %1165 = vmatpush.msrb.mxu1 %v1792_v23  ;;  %v1894_v6 = vld [vmem:[%s2464_s19 + $0x5e0] sm:$0xff]  ;;  %v1839_v34 = vld [vmem:[%s2464_s19 + $0x428] sm:$0xff] }
 0x1a2   : > { %1184 = vmatpush.msrb.mxu2 %v1809_v51  ;;  %1204 = vmatpush.msrb.mxu3 %v1825_v52  ;;  %v1877_v51 = vld [vmem:[%s2464_s19 + $0x558] sm:$0xff]  ;;  %v1855_v23 = vld [vmem:[%s2464_s19 + $0x4a8] sm:$0xff] }
 0x1a3   : > { %1146 = vmatpush.msrb.mxu0 %v1775_v19  ;;  %1166 = vmatpush.msrb.mxu1 %v1791_v2  ;;  %v1893_v52 = vld [vmem:[%s2464_s19 + $0x5d8] sm:$0xff]  ;;  %v1838_v19 = vld [vmem:[%s2464_s19 + $0x420] sm:$0xff] }
 0x1a4   : > { %1185 = vmatpush.msrb.mxu2 %v1808_v1  ;;  %1205 = vmatpush.msrb.mxu3 %v1824_v18  ;;  %v1876_v1 = vld [vmem:[%s2464_s19 + $0x550] sm:$0xff]  ;;  %v1854_v2 = vld [vmem:[%s2464_s19 + $0x4a0] sm:$0xff] }
 0x1a5   : > { %1147 = vmatpush.msrb.mxu0 %v1774_v47  ;;  %1167 = vmatpush.msrb.mxu1 %v1790_v48  ;;  %v1892_v18 = vld [vmem:[%s2464_s19 + $0x5d0] sm:$0xff]  ;;  %v1837_v47 = vld [vmem:[%s2464_s19 + $0x418] sm:$0xff] }
 0x1a6   : > { %1186 = vmatpush.msrb.mxu2 %v1807_v42  ;;  %1206 = vmatpush.msrb.mxu3 %v1823_v7  ;;  %v1875_v42 = vld [vmem:[%s2464_s19 + $0x548] sm:$0xff]  ;;  %v1853_v48 = vld [vmem:[%s2464_s19 + $0x498] sm:$0xff] }
 0x1a7   : > { %1148 = vmatpush.msrb.mxu0 %v1773_v61  ;;  %1168 = vmatpush.msrb.mxu1 %v1789_v62  ;;  %v1891_v7 = vld [vmem:[%s2464_s19 + $0x5c8] sm:$0xff]  ;;  %v1836_v61 = vld [vmem:[%s2464_s19 + $0x410] sm:$0xff] }
 0x1a8   : > { %1187 = vmatpush.msrb.mxu2 %v1806_v3  ;;  %1207 = vmatpush.msrb.mxu3 %v1822_v8  ;;  %v1874_v3 = vld [vmem:[%s2464_s19 + $0x540] sm:$0xff]  ;;  %v1852_v62 = vld [vmem:[%s2464_s19 + $0x490] sm:$0xff] }
 0x1a9   : > { %1149 = vmatpush.msrb.mxu0 %v1772_v37  ;;  %1169 = vmatpush.msrb.mxu1 %v1788_v57  ;;  %v1890_v8 = vld [vmem:[%s2464_s19 + $0x5c0] sm:$0xff]  ;;  %v1888_v37 = vld [vmem:[%s2464_s19 + $0x5b0] sm:$0xff]  ;;  %v1851_v57 = vld [vmem:[%s2464_s19 + $0x488] sm:$0xff] }
 0x1aa   : > { %1188 = vmatpush.msrb.mxu2 %v1805_v4  ;;  %1208 = vmatpush.msrb.mxu3 %v1821_v33  ;;  %v1873_v4 = vld [vmem:[%s2464_s19 + $0x538] sm:$0xff] }
 0x1ab   : > { %1150 = vmatpush.msrb.mxu0 %v1771_v58  ;;  %1170 = vmatpush.msrb.mxu1 %v1787_v38  ;;  %v1889_v33 = vld [vmem:[%s2464_s19 + $0x5b8] sm:$0xff]  ;;  %v1871_v38 = vld [vmem:[%s2464_s19 + $0x528] sm:$0xff] }
 0x1ac   : > { %1189 = vmatpush.msrb.mxu2 %v1804_v43  ;;  %1209 = vmatpush.msrb.mxu3 %v1820_v44  ;;  %v1835_v43 = vld [vmem:[%s2464_s19 + $0x408] sm:$0xff] }
 0x1ad   : > { %1151 = vmatpush.msrb.mxu0 %v1770_v26  ;;  %1171 = vmatpush.msrb.mxu1 %v1786_v39  ;;  %v1887_v26 = vld [vmem:[%s2464_s19 + $0x5a8] sm:$0xff]  ;;  %v1834_v39 = vld [vmem:[%s2464_s19 + $0x400] sm:$0xff] }
 0x1ae   : > { %1190 = vmatpush.msrb.mxu2 %v1803_v24  ;;  %1210 = vmatpush.msrb.mxu3 %v1819_v40  ;;  %v1872_v24 = vld [vmem:[%s2464_s19 + $0x530] sm:$0xff]  ;;  %v1850_v40 = vld [vmem:[%s2464_s19 + $0x480] sm:$0xff] }
 0x1b0   : > { %1191 = vmatpush.msrb.mxu2 %v1802_v17  ;;  %1211 = vmatpush.msrb.mxu3 %v1818_v22  ;;  %v1870_v17 = vld [vmem:[%s2464_s19 + $0x520] sm:$0xff] }
 0x1b1   : > { %v1886_v22 = vld [vmem:[%s2464_s19 + $0x5a0] sm:$0xff] }
 0x1e8   : > { %v2901_v28 = vpop.f32.mrf.mxu0  ;;  %v2903_v54 = vpop.f32.mrf.mxu1 }
 0x1e9   : > { %994 = vmatmul.f32.vlgmr.msra.gmra.mxu0 %v2901_v28  ;;  %1014 = vmatmul.f32.vlgmr.msra.gmra.mxu1 %v2903_v54  ;;  %v1128_v15 = vrot.slane %v2901_v28, 2  ;;  %v1129_v16 = vrot.slane %v2903_v54, 2 }
 0x1ea   : > { %1290 = vmatpush.msra.mxu0 %v1849_v41  ;;  %1310 = vmatpush.msra.mxu1 %v1865_v53  ;;  %v1913_v41 = vld [vmem:[%s2464_s19 + $0x678] sm:$0xff] }
 0x1eb   : > { %v1929_v53 = vld [vmem:[%s2464_s19 + $0x6f8] sm:$0xff] }
 0x1ec   : > { %1291 = vmatpush.msra.mxu0 %v1848_v63  ;;  %1311 = vmatpush.msra.mxu1 %v1864_v0  ;;  %v1869_v63 = vld [vmem:[%s2464_s19 + $0x518] sm:$0xff] }
 0x1ed   : > { %v1885_v0 = vld [vmem:[%s2464_s19 + $0x598] sm:$0xff] }
 0x1ee   : > { %1292 = vmatpush.msra.mxu0 %v1847_v35  ;;  %1312 = vmatpush.msra.mxu1 %v1863_v36  ;;  %v1912_v35 = vld [vmem:[%s2464_s19 + $0x670] sm:$0xff] }
 0x1ef   : > { %v1928_v36 = vld [vmem:[%s2464_s19 + $0x6f0] sm:$0xff] }
 0x1f0   : > { %1293 = vmatpush.msra.mxu0 %v1846_v49  ;;  %1313 = vmatpush.msra.mxu1 %v1862_v50  ;;  %v1911_v49 = vld [vmem:[%s2464_s19 + $0x668] sm:$0xff] }
 0x1f1   : > { %1152 = vmatmul.f32.vlgmr.msrb.gmra.mxu0 %v1128_v15  ;;  %1172 = vmatmul.f32.vlgmr.msrb.gmra.mxu1 %v1129_v16  ;;  %v1868_v15 = vld [vmem:[%s2464_s19 + $0x510] sm:$0xff]  ;;  %v1927_v50 = vld [vmem:[%s2464_s19 + $0x6e8] sm:$0xff] }
 0x1f2   : > { %1294 = vmatpush.msra.mxu0 %v1845_v13  ;;  %1314 = vmatpush.msra.mxu1 %v1861_v14  ;;  %v1884_v16 = vld [vmem:[%s2464_s19 + $0x590] sm:$0xff]  ;;  %v1867_v13 = vld [vmem:[%s2464_s19 + $0x508] sm:$0xff] }
 0x1f3   : > { %v1883_v14 = vld [vmem:[%s2464_s19 + $0x588] sm:$0xff] }
 0x1f4   : > { %v2921_v60 = vpop.f32.mrf.mxu2  ;;  %v2923_v25 = vpop.f32.mrf.mxu3  ;;  %1295 = vmatpush.msra.mxu0 %v1844_v31  ;;  %1315 = vmatpush.msra.mxu1 %v1860_v59  ;;  %v1910_v31 = vld [vmem:[%s2464_s19 + $0x660] sm:$0xff] }
 0x1f5   : > { %1034 = vmatmul.f32.vlgmr.msra.gmra.mxu2 %v2921_v60  ;;  %1054 = vmatmul.f32.vlgmr.msra.gmra.mxu3 %v2923_v25  ;;  %v1130_v44 = vrot.slane %v2921_v60, 2  ;;  %v1131_v58 = vrot.slane %v2923_v25, 2  ;;  %v1926_v59 = vld [vmem:[%s2464_s19 + $0x6e0] sm:$0xff] }
 0x1f6   : > { %1330 = vmatpush.msra.mxu2 %v1881_v32  ;;  %1350 = vmatpush.msra.mxu3 %v1897_v11  ;;  %v1866_v32 = vld [vmem:[%s2464_s19 + $0x500] sm:$0xff] }
 0x1f7   : > { %1296 = vmatpush.msra.mxu0 %v1843_v45  ;;  %1316 = vmatpush.msra.mxu1 %v1859_v9  ;;  %v1882_v11 = vld [vmem:[%s2464_s19 + $0x580] sm:$0xff]  ;;  %v1945_v45 = vld [vmem:[%s2464_s19 + $0x778] sm:$0xff] }
 0x1f8   : > { %1331 = vmatpush.msra.mxu2 %v1880_v46  ;;  %1351 = vmatpush.msra.mxu3 %v1896_v10  ;;  %v1961_v9 = vld [vmem:[%s2464_s19 + $0x7f8] sm:$0xff] }
 0x1f9   : > { %1297 = vmatpush.msra.mxu0 %v1842_v30  ;;  %1317 = vmatpush.msra.mxu1 %v1858_v55  ;;  %v1909_v46 = vld [vmem:[%s2464_s19 + $0x658] sm:$0xff]  ;;  %v1944_v30 = vld [vmem:[%s2464_s19 + $0x770] sm:$0xff] }
 0x1fa   : > { %1332 = vmatpush.msra.mxu2 %v1879_v27  ;;  %1352 = vmatpush.msra.mxu3 %v1895_v56  ;;  %v1925_v10 = vld [vmem:[%s2464_s19 + $0x6d8] sm:$0xff]  ;;  %v1960_v55 = vld [vmem:[%s2464_s19 + $0x7f0] sm:$0xff] }
 0x1fb   : > { %1298 = vmatpush.msra.mxu0 %v1841_v12  ;;  %1318 = vmatpush.msra.mxu1 %v1857_v20  ;;  %v1908_v27 = vld [vmem:[%s2464_s19 + $0x650] sm:$0xff]  ;;  %v1943_v12 = vld [vmem:[%s2464_s19 + $0x768] sm:$0xff] }
 0x1fc   : > { %1333 = vmatpush.msra.mxu2 %v1878_v5  ;;  %1353 = vmatpush.msra.mxu3 %v1894_v6  ;;  %v1924_v56 = vld [vmem:[%s2464_s19 + $0x6d0] sm:$0xff]  ;;  %v1959_v20 = vld [vmem:[%s2464_s19 + $0x7e8] sm:$0xff] }
 0x1fd   : > { %1299 = vmatpush.msra.mxu0 %v1840_v21  ;;  %1319 = vmatpush.msra.mxu1 %v1856_v29  ;;  %v1907_v5 = vld [vmem:[%s2464_s19 + $0x648] sm:$0xff]  ;;  %v1942_v21 = vld [vmem:[%s2464_s19 + $0x760] sm:$0xff] }
 0x1fe   : > { %1334 = vmatpush.msra.mxu2 %v1877_v51  ;;  %1354 = vmatpush.msra.mxu3 %v1893_v52  ;;  %v1923_v6 = vld [vmem:[%s2464_s19 + $0x6c8] sm:$0xff]  ;;  %v1958_v29 = vld [vmem:[%s2464_s19 + $0x7e0] sm:$0xff] }
 0x1ff   : > { %1300 = vmatpush.msra.mxu0 %v1839_v34  ;;  %1320 = vmatpush.msra.mxu1 %v1855_v23  ;;  %v1906_v51 = vld [vmem:[%s2464_s19 + $0x640] sm:$0xff]  ;;  %v1941_v34 = vld [vmem:[%s2464_s19 + $0x758] sm:$0xff] }
 0x200   : > { %1335 = vmatpush.msra.mxu2 %v1876_v1  ;;  %1355 = vmatpush.msra.mxu3 %v1892_v18  ;;  %v1922_v52 = vld [vmem:[%s2464_s19 + $0x6c0] sm:$0xff]  ;;  %v1957_v23 = vld [vmem:[%s2464_s19 + $0x7d8] sm:$0xff] }
 0x201   : > { %1301 = vmatpush.msra.mxu0 %v1838_v19  ;;  %1321 = vmatpush.msra.mxu1 %v1854_v2  ;;  %v1905_v1 = vld [vmem:[%s2464_s19 + $0x638] sm:$0xff]  ;;  %v1940_v19 = vld [vmem:[%s2464_s19 + $0x750] sm:$0xff] }
 0x202   : > { %1336 = vmatpush.msra.mxu2 %v1875_v42  ;;  %1356 = vmatpush.msra.mxu3 %v1891_v7  ;;  %v1921_v18 = vld [vmem:[%s2464_s19 + $0x6b8] sm:$0xff]  ;;  %v1956_v2 = vld [vmem:[%s2464_s19 + $0x7d0] sm:$0xff] }
 0x203   : > { %1302 = vmatpush.msra.mxu0 %v1837_v47  ;;  %1322 = vmatpush.msra.mxu1 %v1853_v48  ;;  %v1904_v42 = vld [vmem:[%s2464_s19 + $0x630] sm:$0xff]  ;;  %v1939_v47 = vld [vmem:[%s2464_s19 + $0x748] sm:$0xff] }
 0x204   : > { %1337 = vmatpush.msra.mxu2 %v1874_v3  ;;  %1357 = vmatpush.msra.mxu3 %v1890_v8  ;;  %v1920_v7 = vld [vmem:[%s2464_s19 + $0x6b0] sm:$0xff]  ;;  %v1955_v48 = vld [vmem:[%s2464_s19 + $0x7c8] sm:$0xff]  ;;  %v1284_v8 = vrot.slane %v2921_v60, 4 }
 0x205   : > { %1303 = vmatpush.msra.mxu0 %v1836_v61  ;;  %1323 = vmatpush.msra.mxu1 %v1852_v62  ;;  %v1903_v3 = vld [vmem:[%s2464_s19 + $0x628] sm:$0xff]  ;;  %v1938_v61 = vld [vmem:[%s2464_s19 + $0x740] sm:$0xff] }
 0x206   : > { %1338 = vmatpush.msra.mxu2 %v1873_v4  ;;  %1358 = vmatpush.msra.mxu3 %v1889_v33  ;;  %v1954_v62 = vld [vmem:[%s2464_s19 + $0x7c0] sm:$0xff]  ;;  %v1919_v4 = vld [vmem:[%s2464_s19 + $0x6a8] sm:$0xff]  ;;  %v1285_v33 = vrot.slane %v2923_v25, 4 }
 0x207   : > { %1192 = vmatmul.f32.vlgmr.msrb.gmra.mxu2 %v1130_v44  ;;  %1304 = vmatpush.msra.mxu0 %v1835_v43  ;;  %v1937_v43 = vld [vmem:[%s2464_s19 + $0x738] sm:$0xff] }
 0x208   : > { %1339 = vmatpush.msra.mxu2 %v1872_v24  ;;  %1359 = vmatpush.msra.mxu3 %v1888_v37  ;;  %v1953_v44 = vld [vmem:[%s2464_s19 + $0x7b8] sm:$0xff]  ;;  %v1902_v24 = vld [vmem:[%s2464_s19 + $0x620] sm:$0xff] }
 0x209   : > { %1324 = vmatpush.msra.mxu1 %v1851_v57  ;;  %1212 = vmatmul.f32.vlgmr.msrb.gmra.mxu3 %v1131_v58  ;;  %v1918_v37 = vld [vmem:[%s2464_s19 + $0x6a0] sm:$0xff]  ;;  %v1936_v57 = vld [vmem:[%s2464_s19 + $0x730] sm:$0xff] }
 0x20a   : > { %1340 = vmatpush.msra.mxu2 %v1871_v38  ;;  %1360 = vmatpush.msra.mxu3 %v1887_v26  ;;  %v1952_v58 = vld [vmem:[%s2464_s19 + $0x7b0] sm:$0xff]  ;;  %v1282_v38 = vrot.slane %v2901_v28, 4  ;;  %v1283_v26 = vrot.slane %v2903_v54, 4 }
 0x20b   : > { %1305 = vmatpush.msra.mxu0 %v1834_v39  ;;  %1325 = vmatpush.msra.mxu1 %v1850_v40  ;;  %v1935_v39 = vld [vmem:[%s2464_s19 + $0x728] sm:$0xff] }
 0x20c   : > { %1341 = vmatpush.msra.mxu2 %v1870_v17  ;;  %1361 = vmatpush.msra.mxu3 %v1886_v22  ;;  %v1951_v40 = vld [vmem:[%s2464_s19 + $0x7a8] sm:$0xff]  ;;  %v1901_v17 = vld [vmem:[%s2464_s19 + $0x618] sm:$0xff] }
 0x20d   : > { %1444 = vmatpush.msrb.mxu0 %v1913_v41  ;;  %1464 = vmatpush.msrb.mxu1 %v1929_v53  ;;  %v1917_v22 = vld [vmem:[%s2464_s19 + $0x698] sm:$0xff]  ;;  %v1934_v41 = vld [vmem:[%s2464_s19 + $0x720] sm:$0xff] }
 0x20e   : > { %1342 = vmatpush.msra.mxu2 %v1869_v63  ;;  %1362 = vmatpush.msra.mxu3 %v1885_v0  ;;  %v1950_v53 = vld [vmem:[%s2464_s19 + $0x7a0] sm:$0xff]  ;;  %v1900_v63 = vld [vmem:[%s2464_s19 + $0x610] sm:$0xff] }
 0x20f   : > { %1445 = vmatpush.msrb.mxu0 %v1912_v35  ;;  %1465 = vmatpush.msrb.mxu1 %v1928_v36  ;;  %v1916_v0 = vld [vmem:[%s2464_s19 + $0x690] sm:$0xff]  ;;  %v1933_v35 = vld [vmem:[%s2464_s19 + $0x718] sm:$0xff] }
 0x210   : > { %1343 = vmatpush.msra.mxu2 %v1868_v15  ;;  %1363 = vmatpush.msra.mxu3 %v1884_v16  ;;  %v1949_v36 = vld [vmem:[%s2464_s19 + $0x798] sm:$0xff]  ;;  %v1899_v15 = vld [vmem:[%s2464_s19 + $0x608] sm:$0xff] }
 0x211   : > { %1446 = vmatpush.msrb.mxu0 %v1911_v49  ;;  %1466 = vmatpush.msrb.mxu1 %v1927_v50  ;;  %v1915_v16 = vld [vmem:[%s2464_s19 + $0x688] sm:$0xff]  ;;  %v1932_v49 = vld [vmem:[%s2464_s19 + $0x710] sm:$0xff] }
 0x212   : > { %1344 = vmatpush.msra.mxu2 %v1867_v13  ;;  %1364 = vmatpush.msra.mxu3 %v1883_v14  ;;  %v1948_v50 = vld [vmem:[%s2464_s19 + $0x790] sm:$0xff]  ;;  %v1898_v13 = vld [vmem:[%s2464_s19 + $0x600] sm:$0xff] }
 0x213   : > { %1447 = vmatpush.msrb.mxu0 %v1910_v31  ;;  %1467 = vmatpush.msrb.mxu1 %v1926_v59  ;;  %v1914_v14 = vld [vmem:[%s2464_s19 + $0x680] sm:$0xff]  ;;  %v1931_v31 = vld [vmem:[%s2464_s19 + $0x708] sm:$0xff] }
 0x214   : > { %1345 = vmatpush.msra.mxu2 %v1866_v32  ;;  %1365 = vmatpush.msra.mxu3 %v1882_v11  ;;  %v1947_v59 = vld [vmem:[%s2464_s19 + $0x788] sm:$0xff]  ;;  %v1436_v32 = vrot.slane %v2901_v28, 6  ;;  %v1437_v11 = vrot.slane %v2903_v54, 6 }
 0x215   : > { %1448 = vmatpush.msrb.mxu0 %v1909_v46  ;;  %1468 = vmatpush.msrb.mxu1 %v1925_v10  ;;  %v1438_v46 = vrot.slane %v2921_v60, 6  ;;  %v1439_v10 = vrot.slane %v2923_v25, 6 }
 0x216   : > { %1484 = vmatpush.msrb.mxu2 %v1945_v45  ;;  %1504 = vmatpush.msrb.mxu3 %v1961_v9  ;;  %v1930_v45 = vld [vmem:[%s2464_s19 + $0x700] sm:$0xff] }
 0x217   : > { %1449 = vmatpush.msrb.mxu0 %v1908_v27  ;;  %1469 = vmatpush.msrb.mxu1 %v1924_v56  ;;  %v1946_v9 = vld [vmem:[%s2464_s19 + $0x780] sm:$0xff] }
 0x218   : > { %1485 = vmatpush.msrb.mxu2 %v1944_v30  ;;  %1505 = vmatpush.msrb.mxu3 %v1960_v55 }
 0x219   : > { %1450 = vmatpush.msrb.mxu0 %v1907_v5  ;;  %1470 = vmatpush.msrb.mxu1 %v1923_v6 }
 0x21a   : > { %1486 = vmatpush.msrb.mxu2 %v1943_v12  ;;  %1506 = vmatpush.msrb.mxu3 %v1959_v20 }
 0x21b   : > { %1451 = vmatpush.msrb.mxu0 %v1906_v51  ;;  %1471 = vmatpush.msrb.mxu1 %v1922_v52 }
 0x21c   : > { %1487 = vmatpush.msrb.mxu2 %v1942_v21  ;;  %1507 = vmatpush.msrb.mxu3 %v1958_v29 }
 0x21d   : > { %1452 = vmatpush.msrb.mxu0 %v1905_v1  ;;  %1472 = vmatpush.msrb.mxu1 %v1921_v18  ;;  %v913_v18 = vld [vmem:[#allocation2] sm:$0x3] }
 0x21e   : > { %1488 = vmatpush.msrb.mxu2 %v1941_v34  ;;  %1508 = vmatpush.msrb.mxu3 %v1957_v23 }
 0x21f   : > { %1453 = vmatpush.msrb.mxu0 %v1904_v42  ;;  %1473 = vmatpush.msrb.mxu1 %v1920_v7 }
 0x220   : > { %1489 = vmatpush.msrb.mxu2 %v1940_v19  ;;  %1509 = vmatpush.msrb.mxu3 %v1956_v2 }
 0x221   : > { %1346 = vmatmul.f32.vlgmr.msra.gmra.mxu2 %v1284_v8  ;;  %1454 = vmatpush.msrb.mxu0 %v1903_v3 }
 0x222   : > { %1490 = vmatpush.msrb.mxu2 %v1939_v47  ;;  %1510 = vmatpush.msrb.mxu3 %v1955_v48 }
 0x223   : > { %1474 = vmatpush.msrb.mxu1 %v1919_v4  ;;  %1366 = vmatmul.f32.vlgmr.msra.gmra.mxu3 %v1285_v33 }
 0x224   : > { %1491 = vmatpush.msrb.mxu2 %v1938_v61  ;;  %1511 = vmatpush.msrb.mxu3 %v1954_v62 }
 0x225   : > { %1455 = vmatpush.msrb.mxu0 %v1902_v24  ;;  %1475 = vmatpush.msrb.mxu1 %v1918_v37 }
 0x226   : > { %1492 = vmatpush.msrb.mxu2 %v1937_v43  ;;  %1512 = vmatpush.msrb.mxu3 %v1953_v44 }
 0x227   : > { %1306 = vmatmul.f32.vlgmr.msra.gmra.mxu0 %v1282_v38  ;;  %1326 = vmatmul.f32.vlgmr.msra.gmra.mxu1 %v1283_v26 }
 0x228   : > { %1493 = vmatpush.msrb.mxu2 %v1936_v57  ;;  %1513 = vmatpush.msrb.mxu3 %v1952_v58 }
 0x229   : > { %1456 = vmatpush.msrb.mxu0 %v1901_v17  ;;  %1476 = vmatpush.msrb.mxu1 %v1917_v22 }
 0x22a   : > { %1494 = vmatpush.msrb.mxu2 %v1935_v39  ;;  %1514 = vmatpush.msrb.mxu3 %v1951_v40 }
 0x22b   : > { %1457 = vmatpush.msrb.mxu0 %v1900_v63  ;;  %1477 = vmatpush.msrb.mxu1 %v1916_v0 }
 0x22c   : > { %1495 = vmatpush.msrb.mxu2 %v1934_v41  ;;  %1515 = vmatpush.msrb.mxu3 %v1950_v53 }
 0x22d   : > { %1458 = vmatpush.msrb.mxu0 %v1899_v15  ;;  %1478 = vmatpush.msrb.mxu1 %v1915_v16 }
 0x22e   : > { %1496 = vmatpush.msrb.mxu2 %v1933_v35  ;;  %1516 = vmatpush.msrb.mxu3 %v1949_v36 }
 0x22f   : > { %1459 = vmatpush.msrb.mxu0 %v1898_v13  ;;  %1479 = vmatpush.msrb.mxu1 %v1914_v14 }
 0x230   : > { %1497 = vmatpush.msrb.mxu2 %v1932_v49  ;;  %1517 = vmatpush.msrb.mxu3 %v1948_v50 }
 0x231   : > { %1460 = vmatmul.f32.vlgmr.msrb.gmra.mxu0 %v1436_v32  ;;  %1480 = vmatmul.f32.vlgmr.msrb.gmra.mxu1 %v1437_v11 }
 0x232   : > { %1498 = vmatpush.msrb.mxu2 %v1931_v31  ;;  %1518 = vmatpush.msrb.mxu3 %v1947_v59 }
 0x234   : > { %1499 = vmatpush.msrb.mxu2 %v1930_v45  ;;  %1519 = vmatpush.msrb.mxu3 %v1946_v9 }
 0x235   : > { %1500 = vmatmul.f32.vlgmr.msrb.gmra.mxu2 %v1438_v46  ;;  %1520 = vmatmul.f32.vlgmr.msrb.gmra.mxu3 %v1439_v10 }
 0x266   : > { %v995_v30 = vpop.f32.mrf.mxu0  ;;  %v1015_v28 = vpop.f32.mrf.mxu1 }
 0x267   : > { %v1016_v5 = vadd.f32 %v1015_v28, %v995_v30 }
 0x26e   : > { %v1153_v27 = vpop.f32.mrf.mxu0  ;;  %v1173_v56 = vpop.f32.mrf.mxu1 }
 0x26f   : > { %v1174_v29 = vadd.f32 %v1173_v56, %v1153_v27 }
 0x278   : > { %v1035_v55 = vpop.f32.mrf.mxu2  ;;  %v1055_v54 = vpop.f32.mrf.mxu3 }
 0x279   : > { %v1036_v60 = vadd.f32 %v1035_v55, %v1016_v5 }
 0x27b   : > { %v1056_v23 = vadd.f32 %v1055_v54, %v1036_v60 }
 0x27d   : > { %v1058_v7 = vadd.f32 %v1056_v23, %v913_v18 }
 0x28a   : > { %v1193_v12 = vpop.f32.mrf.mxu2 }
 0x28b   : > { %v1194_v51 = vadd.f32 %v1193_v12, %v1174_v29 }
 0x28c   : > { %v1213_v20 = vpop.f32.mrf.mxu3 }
 0x28d   : > { %v1214_v42 = vadd.f32 %v1213_v20, %v1194_v51 }
 0x28f   : > { %v1216_v8 = vadd.f32 %v1214_v42, %v1058_v7 }
 0x2a4   : > { %v1307_v6 = vpop.f32.mrf.mxu0  ;;  %v1327_v21 = vpop.f32.mrf.mxu1 }
 0x2a5   : > { %v1347_v25 = vpop.f32.mrf.mxu2  ;;  %v1328_v52 = vadd.f32 %v1327_v21, %v1307_v6 }
 0x2a6   : > { %v1367_v34 = vpop.f32.mrf.mxu3 }
 0x2a7   : > { %v1348_v1 = vadd.f32 %v1347_v25, %v1328_v52 }
 0x2a9   : > { %v1368_v47 = vadd.f32 %v1367_v34, %v1348_v1 }
 0x2ab   : > { %v1370_v4 = vadd.f32 %v1368_v47, %v1216_v8 }
 0x2ae   : > { %v1461_v19 = vpop.f32.mrf.mxu0  ;;  %v1481_v2 = vpop.f32.mrf.mxu1 }
 0x2af   : > { %v1482_v48 = vadd.f32 %v1481_v2, %v1461_v19 }
 0x2b8   : > { %v1501_v3 = vpop.f32.mrf.mxu2  ;;  %v1521_v62 = vpop.f32.mrf.mxu3 }
 0x2b9   : > { %v1502_v61 = vadd.f32 %v1501_v3, %v1482_v48 }
 0x2bb   : > { %v1522_v33 = vadd.f32 %v1521_v62, %v1502_v61  ;;  %1529 = sbr.rel (%p1962_p1) target bundleno = 865 (0x361), region = 84 }
 0x2bd   : > { %v1524_v43 = vadd.f32 %v1522_v33, %v1370_v4 }
 0x2bf   : > { %1525 = vst [vmem:[#allocation2] sm:$0x3] %v1524_v43 }
 0x2c0   : > { %v1552_v44 = vld [vmem:[%s3122_s6 + $0x78] sm:$0xff]  ;;  %v1551_v24 = vld [vmem:[%s3122_s6 + $0x70] sm:$0xff]  ;;  %v1550_v37 = vld [vmem:[%s3122_s6 + $0x68] sm:$0xff]  ;;  %vm1577_vm2 = vcmask 9216  }
 0x2c1   : > { %1557 = vmatpush.msra.mxu0 %v1552_v44  ;;  %v1549_v57 = vld [vmem:[%s3122_s6 + $0x60] sm:$0xff]  ;;  %v1548_v58 = vld [vmem:[%s3122_s6 + $0x58] sm:$0xff]  ;;  %v1547_v38 = vld [vmem:[%s3122_s6 + $0x50] sm:$0xff] }
 0x2c2   : > { %v1546_v26 = vld [vmem:[%s3122_s6 + $0x48] sm:$0xff]  ;;  %v1545_v39 = vld [vmem:[%s3122_s6 + $0x40] sm:$0xff]  ;;  %v1544_v40 = vld [vmem:[%s3122_s6 + $0x38] sm:$0xff] }
 0x2c3   : > { %1558 = vmatpush.msra.mxu0 %v1551_v24  ;;  %v1543_v17 = vld [vmem:[%s3122_s6 + $0x30] sm:$0xff]  ;;  %v1542_v22 = vld [vmem:[%s3122_s6 + $0x28] sm:$0xff]  ;;  %v1541_v41 = vld [vmem:[%s3122_s6 + $0x20] sm:$0xff] }
 0x2c4   : > { %v2061_v53 = vld [vmem:[#allocation10] ss:$0 sm:$0xff]  ;;  %v1540_v0 = vld [vmem:[%s3122_s6 + $0x18] sm:$0xff]  ;;  %v1539_v35 = vld [vmem:[%s3122_s6 + $0x10] sm:$0xff] }
 0x2c5   : > { %1559 = vmatpush.msra.mxu0 %v1550_v37  ;;  %v1538_v15 = vld [vmem:[%s3122_s6 + $0x8] sm:$0xff]  ;;  %v1537_v16 = vld [vmem:[%s3122_s6] sm:$0xff] }
 0x2c6   : > { %v1530_v63 = vld [vmem:[#allocation2] sm:$0x3] }
 0x2c7   : > { %1560 = vmatpush.msra.mxu0 %v1549_v57  ;;  %v1535_v36 = vadd.f32 %v2061_v53, %v1530_v63  ;;  %v2062_v50 = vld [vmem:[#allocation11] ss:$0 sm:$0xff] }
 0x2c9   : > { %1561 = vmatpush.msra.mxu0 %v1548_v58  ;;  %v1536_v49 = vmax.f32 %v1535_v36, 0.0 }
 0x2cb   : > { %1562 = vmatpush.msra.mxu0 %v1547_v38 }
 0x2cd   : > { %1563 = vmatpush.msra.mxu0 %v1546_v26 }
 0x2cf   : > { %1564 = vmatpush.msra.mxu0 %v1545_v39 }
 0x2d1   : > { %1565 = vmatpush.msra.mxu0 %v1544_v40 }
 0x2d3   : > { %1566 = vmatpush.msra.mxu0 %v1543_v17 }
 0x2d5   : > { %1567 = vmatpush.msra.mxu0 %v1542_v22 }
 0x2d7   : > { %1568 = vmatpush.msra.mxu0 %v1541_v41 }
 0x2d9   : > { %1569 = vmatpush.msra.mxu0 %v1540_v0 }
 0x2db   : > { %1570 = vmatpush.msra.mxu0 %v1539_v35 }
 0x2dd   : > { %1571 = vmatpush.msra.mxu0 %v1538_v15 }
 0x2df   : > { %1572 = vmatpush.msra.mxu0 %v1537_v16 }
 0x2e0   : > { %1573 = vmatmul.f32.vlgmr.msra.gmra.mxu0 %v1536_v49 }
 0x35d   : > { %v1574_v13 = vpop.f32.mrf.mxu0 }
 0x35e   : > { %v1575_v14 = vadd.f32 %v2062_v50, %v1574_v13 }
 0x360   : > { %1578 = vst.msk [vmem:[%s3124_s8] sm:$0x3] %vm1577_vm2, %v1575_v14 }
 0x361 PF: > { %p21_p4 = scmp.ge.s32.totalorder %s2416_s23, 6   ;;  %s3155_s27 = smov %s2285_s28 }
 0x362   : > { %s3156_s28 = smov %s2289_s29  ;;  %s3157_s29 = smov %s2428_s26 }
 0x363   : > { %s3158_s30 = smov %s2416_s23  ;;  %23 = sbr.rel (!%p21_p4) target bundleno = 6 (0x6), region = 124 }
 0x368   :  { %1590 = vsyncpa [#allocation4], 1 }
 0x369   :  { %1592 = vsyncpa [#allocation4 + $0x1], 1 }
 0x36a   :  { %1593 = vsyncpa [#allocation6], 1 }
 0x36b   :  { %1594 = vsyncpa [#allocation9], 1 }
 0x36c   :  { %1596 = vsyncpa [#allocation9 + $0x1], 1 }
 0x36d   :  { %1597 = vsyncpa [#allocation12], 1 }

</bundles_post_ra>
